<compile_context>
chip_gen: v5e
topology: v5e:2x2
jax: 0.10.0
libtpu: 0.0.40
codegen_flags: <defaults>
</compile_context>

<pallas_src>
import jax
import jax.numpy as jnp
from jax import lax
from jax.experimental import pallas as pl
from jax.experimental.pallas import tpu as pltpu

EPSILON = 1e-6        # clamp epsilon used in the PyTorch module
GN_EPS = 1e-5         # nn.GroupNorm default eps
LEAKY_SLOPE = 0.01    # nn.LeakyReLU default negative_slope

# Column layout of the packed (Cout, 22) per-channel parameter array.
(_B_IN1, _G_IN1, _BE_IN1,
 _B_IN2, _G_IN2, _BE_IN2,
 _B_PR1, _G_PR1, _BE_PR1,
 _B_PR2, _G_PR2, _BE_PR2,
 _B_PS, _G_PS, _BE_PS,
 _B_A2, _G_A2, _BE_A2,
 _W1, _W2, _W3, _BIAS) = range(22)
_NV_C = 22
# Columns of the packed (Cmid, 3) array (attention hidden branch).
_B_A1, _G_A1, _BE_A1 = range(3)


# ----------------------------------------------------------------------------
# Fused kernel: entire PriorGate forward for one sample per grid step.
# ----------------------------------------------------------------------------
def _prior_gate_kernel(x_ref, pr_ref, ps_ref,
                       w_in1_ref, w_in2_ref,
                       w_pr1_ref, w_pr2_ref,
                       w_ps_ref, w_a1_ref, w_a2_ref,
                       vc_ref, vm_ref, o_ref):
    x = x_ref[0]          # (Cin, HW)  f32
    pr = pr_ref[0]        # (Cin, HW)
    ps = ps_ref[0]        # (3,  HW)
    vc = vc_ref[...]      # (Cout, 22) f32 packed per-channel params
    vm = vm_ref[...]      # (Cmid, 3)

    def ccol(i):          # (Cout, 1) column, broadcasts over lanes (HW)
        return vc[:, i:i + 1]

    def mcol(i):          # (Cmid, 1) column
        return vm[:, i:i + 1]

    def conv1x1(w_ref, h, b):
        # 1x1 conv == channel matmul; bf16 operands, f32 accumulation on MXU.
        y = jnp.dot(w_ref[...], h.astype(jnp.bfloat16),
                    preferred_element_type=jnp.float32)
        return y + b

    def gn1(y, gamma, beta):
        # GroupNorm(num_groups=1): one mean/var per sample over (C, H*W).
        mean = jnp.mean(y, axis=(0, 1), keepdims=True)
        var = jnp.mean(jnp.square(y - mean), axis=(0, 1), keepdims=True)
        return (y - mean) * lax.rsqrt(var + GN_EPS) * gamma + beta

    def lrelu(y):
        return jnp.where(y >= 0, y, LEAKY_SLOPE * y)

    def sigmoid(z):
        return 1.0 / (1.0 + jnp.exp(-z))

    # --- Conv_Input ---------------------------------------------------------
    h = lrelu(gn1(conv1x1(w_in1_ref, x, ccol(_B_IN1)), ccol(_G_IN1), ccol(_BE_IN1)))
    x_in = lrelu(gn1(conv1x1(w_in2_ref, h, ccol(_B_IN2)), ccol(_G_IN2), ccol(_BE_IN2)))

    # --- Conv_Prior ---------------------------------------------------------
    h = lrelu(gn1(conv1x1(w_pr1_ref, pr, ccol(_B_PR1)), ccol(_G_PR1), ccol(_BE_PR1)))
    x_pr = lrelu(gn1(conv1x1(w_pr2_ref, h, ccol(_B_PR2)), ccol(_G_PR2), ccol(_BE_PR2)))

    # --- Psnr_Map -----------------------------------------------------------
    x_ps = lrelu(gn1(conv1x1(w_ps_ref, ps, ccol(_B_PS)), ccol(_G_PS), ccol(_BE_PS)))

    # --- Attention ----------------------------------------------------------
    # TODO(synk): nn.Dropout2d(0.2) in training mode (stochastic channel
    # masking + 1/(1-p) scaling) not implemented; inference identity used.
    a = lrelu(gn1(conv1x1(w_a1_ref, x_in, mcol(_B_A1)), mcol(_G_A1), mcol(_BE_A1)))
    att = sigmoid(gn1(conv1x1(w_a2_ref, a, ccol(_B_A2)), ccol(_G_A2), ccol(_BE_A2)))
    att = jnp.clip(att, EPSILON, 1.0 - EPSILON)

    # --- gating -------------------------------------------------------------
    xi = x_in * att
    xp = x_pr * (1.0 - att)
    gate = xi * ccol(_W1) + xp * ccol(_W2) + x_ps * ccol(_W3) + ccol(_BIAS)
    gate = sigmoid(jnp.clip(gate, -10.0, 10.0))

    o_ref[0] = xp * gate + xi * (1.0 - gate)


# ----------------------------------------------------------------------------
# Wrapper
# ----------------------------------------------------------------------------
def prior_gate(x, prior, psnr_map, params):
    """PriorGate forward. x/prior: (N, Cin, H, W); psnr_map: (N, 3, H, W) NCHW."""
    N, Cin, H, W = x.shape
    HW = H * W
    Cout = params["w_in1"].shape[0]
    Cmid = params["w_a1"].shape[0]

    xf = x.reshape(N, Cin, HW)            # free view reshapes (NCHW native)
    pf = prior.reshape(N, Cin, HW)
    sf = psnr_map.reshape(N, 3, HW)

    def sample_spec(c):
        return pl.BlockSpec((1, c, HW), lambda n: (n, 0, 0))

    def full_spec(shape):
        return pl.BlockSpec(shape, lambda n: (0, 0))

    out = pl.pallas_call(
        _prior_gate_kernel,
        out_shape=jax.ShapeDtypeStruct((N, Cout, HW), jnp.float32),
        grid_spec=pltpu.PrefetchScalarGridSpec(
            num_scalar_prefetch=0,
            grid=(N,),
            in_specs=[
                sample_spec(Cin), sample_spec(Cin), sample_spec(3),
                full_spec((Cout, Cin)), full_spec((Cout, Cout)),
                full_spec((Cout, Cin)), full_spec((Cout, Cout)),
                full_spec((Cout, 3)),
                full_spec((Cmid, Cout)), full_spec((Cout, Cmid)),
                full_spec((Cout, _NV_C)), full_spec((Cmid, 3)),
            ],
            out_specs=pl.BlockSpec((1, Cout, HW), lambda n: (n, 0, 0)),
        ),
        compiler_params=pltpu.CompilerParams(
            dimension_semantics=("parallel",)),
    )(xf, pf, sf,
      params["w_in1"], params["w_in2"],
      params["w_pr1"], params["w_pr2"],
      params["w_ps"], params["w_a1"], params["w_a2"],
      params["vecs_c"], params["vecs_m"])
    return out.reshape(N, Cout, H, W)


# ----------------------------------------------------------------------------
# Parameters (shapes match the PyTorch module; GN affines at torch defaults)
# ----------------------------------------------------------------------------
def init_params(key, in_channels, out_channels, factor=8):
    cmid = max(out_channels // factor, 1)
    keys = iter(jax.random.split(key, 20))

    def rnd(shape, scale=0.3):
        return scale * jax.random.normal(next(keys), shape, jnp.float32)

    # Conv2d 1x1 weights: PyTorch (Cout, Cin, 1, 1) -> (Cout, Cin)
    w_in1 = rnd((out_channels, in_channels));  b_in1 = rnd((out_channels,), 0.1)
    w_in2 = rnd((out_channels, out_channels)); b_in2 = rnd((out_channels,), 0.1)
    w_pr1 = rnd((out_channels, in_channels));  b_pr1 = rnd((out_channels,), 0.1)
    w_pr2 = rnd((out_channels, out_channels)); b_pr2 = rnd((out_channels,), 0.1)
    w_ps = rnd((out_channels, 3));             b_ps = rnd((out_channels,), 0.1)
    w_a1 = rnd((cmid, out_channels));          b_a1 = rnd((cmid,), 0.1)
    w_a2 = rnd((out_channels, cmid));          b_a2 = rnd((out_channels,), 0.1)

    ones_c = jnp.ones((out_channels,), jnp.float32)   # GroupNorm default affine
    zeros_c = jnp.zeros((out_channels,), jnp.float32)
    ones_m = jnp.ones((cmid,), jnp.float32)
    zeros_m = jnp.zeros((cmid,), jnp.float32)

    w1 = rnd((out_channels,), 0.5)   # Weight_1/2/3 (xavier-ish), Bias zeros
    w2 = rnd((out_channels,), 0.5)
    w3 = rnd((out_channels,), 0.5)
    gate_bias = zeros_c

    vecs_c = jnp.stack(
        [b_in1, ones_c, zeros_c,
         b_in2, ones_c, zeros_c,
         b_pr1, ones_c, zeros_c,
         b_pr2, ones_c, zeros_c,
         b_ps, ones_c, zeros_c,
         b_a2, ones_c, zeros_c,
         w1, w2, w3, gate_bias], axis=1)                 # (Cout, 22)
    vecs_m = jnp.stack([b_a1, ones_m, zeros_m], axis=1)  # (Cmid, 3)

    bf16 = lambda a: a.astype(jnp.bfloat16)              # MXU-native weights
    return dict(
        w_in1=bf16(w_in1), w_in2=bf16(w_in2),
        w_pr1=bf16(w_pr1), w_pr2=bf16(w_pr2),
        w_ps=bf16(w_ps), w_a1=bf16(w_a1), w_a2=bf16(w_a2),
        vecs_c=vecs_c, vecs_m=vecs_m,
    )


# ----------------------------------------------------------------------------
# Pure-JAX reference (mirrors the kernel's bf16 matmul casts) for validation
# ----------------------------------------------------------------------------
def _prior_gate_reference(x, prior, psnr_map, params):
    N, _, H, W = x.shape
    flat = lambda a: a.reshape(a.shape[0], a.shape[1], -1)
    xf, pf, sf = flat(x), flat(prior), flat(psnr_map)
    vc, vm = params["vecs_c"], params["vecs_m"]
    ccol = lambda i: vc[:, i][None, :, None]
    mcol = lambda i: vm[:, i][None, :, None]

    def conv(wk, h, b):
        y = jnp.einsum("oc,nch->noh", params[wk], h.astype(jnp.bfloat16),
                       preferred_element_type=jnp.float32)
        return y + b

    def gn1(y, g, b):
        mean = jnp.mean(y, axis=(1, 2), keepdims=True)
        var = jnp.mean(jnp.square(y - mean), axis=(1, 2), keepdims=True)
        return (y - mean) * lax.rsqrt(var + GN_EPS) * g + b

    lrelu = lambda y: jnp.where(y >= 0, y, LEAKY_SLOPE * y)
    sig = lambda z: 1.0 / (1.0 + jnp.exp(-z))

    h = lrelu(gn1(conv("w_in1", xf, ccol(_B_IN1)), ccol(_G_IN1), ccol(_BE_IN1)))
    x_in = lrelu(gn1(conv("w_in2", h, ccol(_B_IN2)), ccol(_G_IN2), ccol(_BE_IN2)))
    h = lrelu(gn1(conv("w_pr1", pf, ccol(_B_PR1)), ccol(_G_PR1), ccol(_BE_PR1)))
    x_pr = lrelu(gn1(conv("w_pr2", h, ccol(_B_PR2)), ccol(_G_PR2), ccol(_BE_PR2)))
    x_ps = lrelu(gn1(conv("w_ps", sf, ccol(_B_PS)), ccol(_G_PS), ccol(_BE_PS)))
    a = lrelu(gn1(conv("w_a1", x_in, mcol(_B_A1)), mcol(_G_A1), mcol(_BE_A1)))
    att = sig(gn1(conv("w_a2", a, ccol(_B_A2)), ccol(_G_A2), ccol(_BE_A2)))
    att = jnp.clip(att, EPSILON, 1.0 - EPSILON)
    xi = x_in * att
    xp = x_pr * (1.0 - att)
    gate = sig(jnp.clip(xi * ccol(_W1) + xp * ccol(_W2) + x_ps * ccol(_W3)
                        + ccol(_BIAS), -10.0, 10.0))
    out = xp * gate + xi * (1.0 - gate)
    return out.reshape(N, -1, H, W)


if __name__ == "__main__":
    key = jax.random.PRNGKey(0)
    k_param, k_x, k_p, k_s = jax.random.split(key, 4)

    N, Cin, H, W = 2, 4, 16, 16
    Cout, factor = 16, 8            # attention hidden channels = 2

    params = init_params(k_param, Cin, Cout, factor)
    x = jax.random.normal(k_x, (N, Cin, H, W), jnp.float32)
    prior = jax.random.normal(k_p, (N, Cin, H, W), jnp.float32)
    psnr_map = jax.random.normal(k_s, (N, 3, H, W), jnp.float32)

    fwd = jax.jit(lambda a, b, c: prior_gate(a, b, c, params))
    out = fwd(x, prior, psnr_map)
    jax.block_until_ready(out)

    assert out.shape == (N, Cout, H, W), out.shape
    assert bool(jnp.all(jnp.isfinite(out)))

    ref = jax.jit(lambda a, b, c: _prior_gate_reference(a, b, c, params))(
        x, prior, psnr_map)
    max_err = float(jnp.max(jnp.abs(out - ref)))
    assert max_err < 1e-2, f"max abs err vs reference: {max_err}"

    print("KERNEL_OK")
</pallas_src>

<mosaic_0001>
module attributes {stable_mosaic.version = 11 : i64} {
  func.func @_prior_gate_kernel(%arg0: i32, %arg1: memref<1x4x256xf32, #tpu.memory_space<vmem>>, %arg2: memref<1x4x256xf32, #tpu.memory_space<vmem>>, %arg3: memref<1x3x256xf32, #tpu.memory_space<vmem>>, %arg4: memref<16x4xbf16, #tpu.memory_space<vmem>>, %arg5: memref<16x16xbf16, #tpu.memory_space<vmem>>, %arg6: memref<16x4xbf16, #tpu.memory_space<vmem>>, %arg7: memref<16x16xbf16, #tpu.memory_space<vmem>>, %arg8: memref<16x3xbf16, #tpu.memory_space<vmem>>, %arg9: memref<2x16xbf16, #tpu.memory_space<vmem>>, %arg10: memref<16x2xbf16, #tpu.memory_space<vmem>>, %arg11: memref<16x22xf32, #tpu.memory_space<vmem>>, %arg12: memref<2x3xf32, #tpu.memory_space<vmem>>, %arg13: memref<1x16x256xf32, #tpu.memory_space<vmem>>) attributes {dimension_semantics = [#tpu.dimension_semantics<parallel>], iteration_bounds = array<i64: 2>, scalar_prefetch = 0 : i64, scratch_operands = 0 : i64, tpu.core_type = #tpu.core_type<tc>, window_params = [{transform_indices = @transform_0, window_bounds = array<i64: 1, 4, 256>}, {transform_indices = @transform_1, window_bounds = array<i64: 1, 4, 256>}, {transform_indices = @transform_2, window_bounds = array<i64: 1, 3, 256>}, {pipeline_mode = #tpu.pipeline_mode<synchronous>, transform_indices = @transform_3, window_bounds = array<i64: 16, 4>}, {pipeline_mode = #tpu.pipeline_mode<synchronous>, transform_indices = @transform_4, window_bounds = array<i64: 16, 16>}, {pipeline_mode = #tpu.pipeline_mode<synchronous>, transform_indices = @transform_5, window_bounds = array<i64: 16, 4>}, {pipeline_mode = #tpu.pipeline_mode<synchronous>, transform_indices = @transform_6, window_bounds = array<i64: 16, 16>}, {pipeline_mode = #tpu.pipeline_mode<synchronous>, transform_indices = @transform_7, window_bounds = array<i64: 16, 3>}, {pipeline_mode = #tpu.pipeline_mode<synchronous>, transform_indices = @transform_8, window_bounds = array<i64: 2, 16>}, {pipeline_mode = #tpu.pipeline_mode<synchronous>, transform_indices = @transform_9, window_bounds = array<i64: 16, 2>}, {pipeline_mode = #tpu.pipeline_mode<synchronous>, transform_indices = @transform_10, window_bounds = array<i64: 16, 22>}, {pipeline_mode = #tpu.pipeline_mode<synchronous>, transform_indices = @transform_11, window_bounds = array<i64: 2, 3>}, {transform_indices = @transform_12, window_bounds = array<i64: 1, 16, 256>}]} {
    %c0 = arith.constant 0 : index
    %c0_0 = arith.constant 0 : index
    %c0_1 = arith.constant 0 : index
    %0 = vector.load %arg1[%c0, %c0_0, %c0_1] : memref<1x4x256xf32, #tpu.memory_space<vmem>>, vector<1x4x256xf32>
    %1 = vector.shape_cast %0 : vector<1x4x256xf32> to vector<4x256xf32>
    %c0_2 = arith.constant 0 : index
    %c0_3 = arith.constant 0 : index
    %c0_4 = arith.constant 0 : index
    %2 = vector.load %arg2[%c0_2, %c0_3, %c0_4] : memref<1x4x256xf32, #tpu.memory_space<vmem>>, vector<1x4x256xf32>
    %3 = vector.shape_cast %2 : vector<1x4x256xf32> to vector<4x256xf32>
    %c0_5 = arith.constant 0 : index
    %c0_6 = arith.constant 0 : index
    %c0_7 = arith.constant 0 : index
    %4 = vector.load %arg3[%c0_5, %c0_6, %c0_7] : memref<1x3x256xf32, #tpu.memory_space<vmem>>, vector<1x3x256xf32>
    %5 = vector.shape_cast %4 : vector<1x3x256xf32> to vector<3x256xf32>
    %c0_8 = arith.constant 0 : index
    %c0_9 = arith.constant 0 : index
    %6 = vector.load %arg11[%c0_8, %c0_9] : memref<16x22xf32, #tpu.memory_space<vmem>>, vector<16x22xf32>
    %c0_10 = arith.constant 0 : index
    %c0_11 = arith.constant 0 : index
    %7 = vector.load %arg12[%c0_10, %c0_11] : memref<2x3xf32, #tpu.memory_space<vmem>>, vector<2x3xf32>
    %8 = vector.extract_strided_slice %6 {offsets = [0, 0], sizes = [16, 1], strides = [1, 1]} : vector<16x22xf32> to vector<16x1xf32>
    %c0_12 = arith.constant 0 : index
    %c0_13 = arith.constant 0 : index
    %9 = vector.load %arg4[%c0_12, %c0_13] : memref<16x4xbf16, #tpu.memory_space<vmem>>, vector<16x4xbf16>
    %10 = arith.truncf %1 : vector<4x256xf32> to vector<4x256xbf16>
    %cst = arith.constant dense<0.000000e+00> : vector<16x256xf32>
    %11 = tpu.matmul %9, %10, %cst {dimension_numbers = #tpu.dot_dimension_numbers<[1], [0], [0], [1], [0, 0, 1, 1], [], []>} : vector<16x4xbf16>, vector<4x256xbf16>, vector<16x256xf32> -> vector<16x256xf32>
    %12 = vector.broadcast %8 : vector<16x1xf32> to vector<16x256xf32>
    %13 = arith.addf %11, %12 : vector<16x256xf32>
    %14 = vector.extract_strided_slice %6 {offsets = [0, 1], sizes = [16, 1], strides = [1, 1]} : vector<16x22xf32> to vector<16x1xf32>
    %15 = vector.extract_strided_slice %6 {offsets = [0, 2], sizes = [16, 1], strides = [1, 1]} : vector<16x22xf32> to vector<16x1xf32>
    %16 = vector.shape_cast %13 : vector<16x256xf32> to vector<1x16x256xf32>
    %cst_14 = arith.constant dense<0.000000e+00> : vector<1xf32>
    %17 = vector.multi_reduction <add>, %16, %cst_14 [1, 2] : vector<1x16x256xf32> to vector<1xf32>
    %18 = vector.shape_cast %17 : vector<1xf32> to vector<1x1x1xf32>
    %19 = vector.extract %18[0, 0, 0] : f32 from vector<1x1x1xf32>
    %20 = vector.broadcast %19 : f32 to vector<1x1xf32>
    %cst_15 = arith.constant 4.096000e+03 : f32
    %21 = vector.broadcast %cst_15 : f32 to vector<1x1xf32>
    %22 = arith.divf %20, %21 : vector<1x1xf32>
    %23 = vector.broadcast %22 : vector<1x1xf32> to vector<16x256xf32>
    %24 = arith.subf %13, %23 : vector<16x256xf32>
    %25 = arith.mulf %24, %24 : vector<16x256xf32>
    %26 = vector.shape_cast %25 : vector<16x256xf32> to vector<1x16x256xf32>
    %cst_16 = arith.constant dense<0.000000e+00> : vector<1xf32>
    %27 = vector.multi_reduction <add>, %26, %cst_16 [1, 2] : vector<1x16x256xf32> to vector<1xf32>
    %28 = vector.shape_cast %27 : vector<1xf32> to vector<1x1x1xf32>
    %29 = vector.extract %28[0, 0, 0] : f32 from vector<1x1x1xf32>
    %30 = vector.broadcast %29 : f32 to vector<1x1xf32>
    %cst_17 = arith.constant 4.096000e+03 : f32
    %31 = vector.broadcast %cst_17 : f32 to vector<1x1xf32>
    %32 = arith.divf %30, %31 : vector<1x1xf32>
    %33 = vector.broadcast %22 : vector<1x1xf32> to vector<16x256xf32>
    %34 = arith.subf %13, %33 : vector<16x256xf32>
    %cst_18 = arith.constant 9.99999974E-6 : f32
    %35 = vector.broadcast %cst_18 : f32 to vector<1x1xf32>
    %36 = arith.addf %32, %35 : vector<1x1xf32>
    %37 = math.rsqrt %36 : vector<1x1xf32>
    %38 = vector.broadcast %37 : vector<1x1xf32> to vector<16x256xf32>
    %39 = arith.mulf %34, %38 : vector<16x256xf32>
    %40 = vector.broadcast %14 : vector<16x1xf32> to vector<16x256xf32>
    %41 = arith.mulf %39, %40 : vector<16x256xf32>
    %42 = vector.broadcast %15 : vector<16x1xf32> to vector<16x256xf32>
    %43 = arith.addf %41, %42 : vector<16x256xf32>
    %cst_19 = arith.constant 0.000000e+00 : f32
    %44 = vector.broadcast %cst_19 : f32 to vector<16x256xf32>
    %45 = arith.cmpf oge, %43, %44 : vector<16x256xf32>
    %cst_20 = arith.constant 0.00999999977 : f32
    %46 = vector.broadcast %cst_20 : f32 to vector<16x256xf32>
    %47 = arith.mulf %46, %43 : vector<16x256xf32>
    %48 = arith.select %45, %43, %47 : vector<16x256xi1>, vector<16x256xf32>
    %49 = vector.extract_strided_slice %6 {offsets = [0, 3], sizes = [16, 1], strides = [1, 1]} : vector<16x22xf32> to vector<16x1xf32>
    %c0_21 = arith.constant 0 : index
    %c0_22 = arith.constant 0 : index
    %50 = vector.load %arg5[%c0_21, %c0_22] : memref<16x16xbf16, #tpu.memory_space<vmem>>, vector<16x16xbf16>
    %51 = arith.truncf %48 : vector<16x256xf32> to vector<16x256xbf16>
    %cst_23 = arith.constant dense<0.000000e+00> : vector<16x256xf32>
    %52 = tpu.matmul %50, %51, %cst_23 {dimension_numbers = #tpu.dot_dimension_numbers<[1], [0], [0], [1], [0, 0, 1, 1], [], []>} : vector<16x16xbf16>, vector<16x256xbf16>, vector<16x256xf32> -> vector<16x256xf32>
    %53 = vector.broadcast %49 : vector<16x1xf32> to vector<16x256xf32>
    %54 = arith.addf %52, %53 : vector<16x256xf32>
    %55 = vector.extract_strided_slice %6 {offsets = [0, 4], sizes = [16, 1], strides = [1, 1]} : vector<16x22xf32> to vector<16x1xf32>
    %56 = vector.extract_strided_slice %6 {offsets = [0, 5], sizes = [16, 1], strides = [1, 1]} : vector<16x22xf32> to vector<16x1xf32>
    %57 = vector.shape_cast %54 : vector<16x256xf32> to vector<1x16x256xf32>
    %cst_24 = arith.constant dense<0.000000e+00> : vector<1xf32>
    %58 = vector.multi_reduction <add>, %57, %cst_24 [1, 2] : vector<1x16x256xf32> to vector<1xf32>
    %59 = vector.shape_cast %58 : vector<1xf32> to vector<1x1x1xf32>
    %60 = vector.extract %59[0, 0, 0] : f32 from vector<1x1x1xf32>
    %61 = vector.broadcast %60 : f32 to vector<1x1xf32>
    %cst_25 = arith.constant 4.096000e+03 : f32
    %62 = vector.broadcast %cst_25 : f32 to vector<1x1xf32>
    %63 = arith.divf %61, %62 : vector<1x1xf32>
    %64 = vector.broadcast %63 : vector<1x1xf32> to vector<16x256xf32>
    %65 = arith.subf %54, %64 : vector<16x256xf32>
    %66 = arith.mulf %65, %65 : vector<16x256xf32>
    %67 = vector.shape_cast %66 : vector<16x256xf32> to vector<1x16x256xf32>
    %cst_26 = arith.constant dense<0.000000e+00> : vector<1xf32>
    %68 = vector.multi_reduction <add>, %67, %cst_26 [1, 2] : vector<1x16x256xf32> to vector<1xf32>
    %69 = vector.shape_cast %68 : vector<1xf32> to vector<1x1x1xf32>
    %70 = vector.extract %69[0, 0, 0] : f32 from vector<1x1x1xf32>
    %71 = vector.broadcast %70 : f32 to vector<1x1xf32>
    %cst_27 = arith.constant 4.096000e+03 : f32
    %72 = vector.broadcast %cst_27 : f32 to vector<1x1xf32>
    %73 = arith.divf %71, %72 : vector<1x1xf32>
    %74 = vector.broadcast %63 : vector<1x1xf32> to vector<16x256xf32>
    %75 = arith.subf %54, %74 : vector<16x256xf32>
    %cst_28 = arith.constant 9.99999974E-6 : f32
    %76 = vector.broadcast %cst_28 : f32 to vector<1x1xf32>
    %77 = arith.addf %73, %76 : vector<1x1xf32>
    %78 = math.rsqrt %77 : vector<1x1xf32>
    %79 = vector.broadcast %78 : vector<1x1xf32> to vector<16x256xf32>
    %80 = arith.mulf %75, %79 : vector<16x256xf32>
    %81 = vector.broadcast %55 : vector<16x1xf32> to vector<16x256xf32>
    %82 = arith.mulf %80, %81 : vector<16x256xf32>
    %83 = vector.broadcast %56 : vector<16x1xf32> to vector<16x256xf32>
    %84 = arith.addf %82, %83 : vector<16x256xf32>
    %cst_29 = arith.constant 0.000000e+00 : f32
    %85 = vector.broadcast %cst_29 : f32 to vector<16x256xf32>
    %86 = arith.cmpf oge, %84, %85 : vector<16x256xf32>
    %cst_30 = arith.constant 0.00999999977 : f32
    %87 = vector.broadcast %cst_30 : f32 to vector<16x256xf32>
    %88 = arith.mulf %87, %84 : vector<16x256xf32>
    %89 = arith.select %86, %84, %88 : vector<16x256xi1>, vector<16x256xf32>
    %90 = vector.extract_strided_slice %6 {offsets = [0, 6], sizes = [16, 1], strides = [1, 1]} : vector<16x22xf32> to vector<16x1xf32>
    %c0_31 = arith.constant 0 : index
    %c0_32 = arith.constant 0 : index
    %91 = vector.load %arg6[%c0_31, %c0_32] : memref<16x4xbf16, #tpu.memory_space<vmem>>, vector<16x4xbf16>
    %92 = arith.truncf %3 : vector<4x256xf32> to vector<4x256xbf16>
    %cst_33 = arith.constant dense<0.000000e+00> : vector<16x256xf32>
    %93 = tpu.matmul %91, %92, %cst_33 {dimension_numbers = #tpu.dot_dimension_numbers<[1], [0], [0], [1], [0, 0, 1, 1], [], []>} : vector<16x4xbf16>, vector<4x256xbf16>, vector<16x256xf32> -> vector<16x256xf32>
    %94 = vector.broadcast %90 : vector<16x1xf32> to vector<16x256xf32>
    %95 = arith.addf %93, %94 : vector<16x256xf32>
    %96 = vector.extract_strided_slice %6 {offsets = [0, 7], sizes = [16, 1], strides = [1, 1]} : vector<16x22xf32> to vector<16x1xf32>
    %97 = vector.extract_strided_slice %6 {offsets = [0, 8], sizes = [16, 1], strides = [1, 1]} : vector<16x22xf32> to vector<16x1xf32>
    %98 = vector.shape_cast %95 : vector<16x256xf32> to vector<1x16x256xf32>
    %cst_34 = arith.constant dense<0.000000e+00> : vector<1xf32>
    %99 = vector.multi_reduction <add>, %98, %cst_34 [1, 2] : vector<1x16x256xf32> to vector<1xf32>
    %100 = vector.shape_cast %99 : vector<1xf32> to vector<1x1x1xf32>
    %101 = vector.extract %100[0, 0, 0] : f32 from vector<1x1x1xf32>
    %102 = vector.broadcast %101 : f32 to vector<1x1xf32>
    %cst_35 = arith.constant 4.096000e+03 : f32
    %103 = vector.broadcast %cst_35 : f32 to vector<1x1xf32>
    %104 = arith.divf %102, %103 : vector<1x1xf32>
    %105 = vector.broadcast %104 : vector<1x1xf32> to vector<16x256xf32>
    %106 = arith.subf %95, %105 : vector<16x256xf32>
    %107 = arith.mulf %106, %106 : vector<16x256xf32>
    %108 = vector.shape_cast %107 : vector<16x256xf32> to vector<1x16x256xf32>
    %cst_36 = arith.constant dense<0.000000e+00> : vector<1xf32>
    %109 = vector.multi_reduction <add>, %108, %cst_36 [1, 2] : vector<1x16x256xf32> to vector<1xf32>
    %110 = vector.shape_cast %109 : vector<1xf32> to vector<1x1x1xf32>
    %111 = vector.extract %110[0, 0, 0] : f32 from vector<1x1x1xf32>
    %112 = vector.broadcast %111 : f32 to vector<1x1xf32>
    %cst_37 = arith.constant 4.096000e+03 : f32
    %113 = vector.broadcast %cst_37 : f32 to vector<1x1xf32>
    %114 = arith.divf %112, %113 : vector<1x1xf32>
    %115 = vector.broadcast %104 : vector<1x1xf32> to vector<16x256xf32>
    %116 = arith.subf %95, %115 : vector<16x256xf32>
    %cst_38 = arith.constant 9.99999974E-6 : f32
    %117 = vector.broadcast %cst_38 : f32 to vector<1x1xf32>
    %118 = arith.addf %114, %117 : vector<1x1xf32>
    %119 = math.rsqrt %118 : vector<1x1xf32>
    %120 = vector.broadcast %119 : vector<1x1xf32> to vector<16x256xf32>
    %121 = arith.mulf %116, %120 : vector<16x256xf32>
    %122 = vector.broadcast %96 : vector<16x1xf32> to vector<16x256xf32>
    %123 = arith.mulf %121, %122 : vector<16x256xf32>
    %124 = vector.broadcast %97 : vector<16x1xf32> to vector<16x256xf32>
    %125 = arith.addf %123, %124 : vector<16x256xf32>
    %cst_39 = arith.constant 0.000000e+00 : f32
    %126 = vector.broadcast %cst_39 : f32 to vector<16x256xf32>
    %127 = arith.cmpf oge, %125, %126 : vector<16x256xf32>
    %cst_40 = arith.constant 0.00999999977 : f32
    %128 = vector.broadcast %cst_40 : f32 to vector<16x256xf32>
    %129 = arith.mulf %128, %125 : vector<16x256xf32>
    %130 = arith.select %127, %125, %129 : vector<16x256xi1>, vector<16x256xf32>
    %131 = vector.extract_strided_slice %6 {offsets = [0, 9], sizes = [16, 1], strides = [1, 1]} : vector<16x22xf32> to vector<16x1xf32>
    %c0_41 = arith.constant 0 : index
    %c0_42 = arith.constant 0 : index
    %132 = vector.load %arg7[%c0_41, %c0_42] : memref<16x16xbf16, #tpu.memory_space<vmem>>, vector<16x16xbf16>
    %133 = arith.truncf %130 : vector<16x256xf32> to vector<16x256xbf16>
    %cst_43 = arith.constant dense<0.000000e+00> : vector<16x256xf32>
    %134 = tpu.matmul %132, %133, %cst_43 {dimension_numbers = #tpu.dot_dimension_numbers<[1], [0], [0], [1], [0, 0, 1, 1], [], []>} : vector<16x16xbf16>, vector<16x256xbf16>, vector<16x256xf32> -> vector<16x256xf32>
    %135 = vector.broadcast %131 : vector<16x1xf32> to vector<16x256xf32>
    %136 = arith.addf %134, %135 : vector<16x256xf32>
    %137 = vector.extract_strided_slice %6 {offsets = [0, 10], sizes = [16, 1], strides = [1, 1]} : vector<16x22xf32> to vector<16x1xf32>
    %138 = vector.extract_strided_slice %6 {offsets = [0, 11], sizes = [16, 1], strides = [1, 1]} : vector<16x22xf32> to vector<16x1xf32>
    %139 = vector.shape_cast %136 : vector<16x256xf32> to vector<1x16x256xf32>
    %cst_44 = arith.constant dense<0.000000e+00> : vector<1xf32>
    %140 = vector.multi_reduction <add>, %139, %cst_44 [1, 2] : vector<1x16x256xf32> to vector<1xf32>
    %141 = vector.shape_cast %140 : vector<1xf32> to vector<1x1x1xf32>
    %142 = vector.extract %141[0, 0, 0] : f32 from vector<1x1x1xf32>
    %143 = vector.broadcast %142 : f32 to vector<1x1xf32>
    %cst_45 = arith.constant 4.096000e+03 : f32
    %144 = vector.broadcast %cst_45 : f32 to vector<1x1xf32>
    %145 = arith.divf %143, %144 : vector<1x1xf32>
    %146 = vector.broadcast %145 : vector<1x1xf32> to vector<16x256xf32>
    %147 = arith.subf %136, %146 : vector<16x256xf32>
    %148 = arith.mulf %147, %147 : vector<16x256xf32>
    %149 = vector.shape_cast %148 : vector<16x256xf32> to vector<1x16x256xf32>
    %cst_46 = arith.constant dense<0.000000e+00> : vector<1xf32>
    %150 = vector.multi_reduction <add>, %149, %cst_46 [1, 2] : vector<1x16x256xf32> to vector<1xf32>
    %151 = vector.shape_cast %150 : vector<1xf32> to vector<1x1x1xf32>
    %152 = vector.extract %151[0, 0, 0] : f32 from vector<1x1x1xf32>
    %153 = vector.broadcast %152 : f32 to vector<1x1xf32>
    %cst_47 = arith.constant 4.096000e+03 : f32
    %154 = vector.broadcast %cst_47 : f32 to vector<1x1xf32>
    %155 = arith.divf %153, %154 : vector<1x1xf32>
    %156 = vector.broadcast %145 : vector<1x1xf32> to vector<16x256xf32>
    %157 = arith.subf %136, %156 : vector<16x256xf32>
    %cst_48 = arith.constant 9.99999974E-6 : f32
    %158 = vector.broadcast %cst_48 : f32 to vector<1x1xf32>
    %159 = arith.addf %155, %158 : vector<1x1xf32>
    %160 = math.rsqrt %159 : vector<1x1xf32>
    %161 = vector.broadcast %160 : vector<1x1xf32> to vector<16x256xf32>
    %162 = arith.mulf %157, %161 : vector<16x256xf32>
    %163 = vector.broadcast %137 : vector<16x1xf32> to vector<16x256xf32>
    %164 = arith.mulf %162, %163 : vector<16x256xf32>
    %165 = vector.broadcast %138 : vector<16x1xf32> to vector<16x256xf32>
    %166 = arith.addf %164, %165 : vector<16x256xf32>
    %cst_49 = arith.constant 0.000000e+00 : f32
    %167 = vector.broadcast %cst_49 : f32 to vector<16x256xf32>
    %168 = arith.cmpf oge, %166, %167 : vector<16x256xf32>
    %cst_50 = arith.constant 0.00999999977 : f32
    %169 = vector.broadcast %cst_50 : f32 to vector<16x256xf32>
    %170 = arith.mulf %169, %166 : vector<16x256xf32>
    %171 = arith.select %168, %166, %170 : vector<16x256xi1>, vector<16x256xf32>
    %172 = vector.extract_strided_slice %6 {offsets = [0, 12], sizes = [16, 1], strides = [1, 1]} : vector<16x22xf32> to vector<16x1xf32>
    %c0_51 = arith.constant 0 : index
    %c0_52 = arith.constant 0 : index
    %173 = vector.load %arg8[%c0_51, %c0_52] : memref<16x3xbf16, #tpu.memory_space<vmem>>, vector<16x3xbf16>
    %174 = arith.truncf %5 : vector<3x256xf32> to vector<3x256xbf16>
    %cst_53 = arith.constant dense<0.000000e+00> : vector<16x256xf32>
    %175 = tpu.matmul %173, %174, %cst_53 {dimension_numbers = #tpu.dot_dimension_numbers<[1], [0], [0], [1], [0, 0, 1, 1], [], []>} : vector<16x3xbf16>, vector<3x256xbf16>, vector<16x256xf32> -> vector<16x256xf32>
    %176 = vector.broadcast %172 : vector<16x1xf32> to vector<16x256xf32>
    %177 = arith.addf %175, %176 : vector<16x256xf32>
    %178 = vector.extract_strided_slice %6 {offsets = [0, 13], sizes = [16, 1], strides = [1, 1]} : vector<16x22xf32> to vector<16x1xf32>
    %179 = vector.extract_strided_slice %6 {offsets = [0, 14], sizes = [16, 1], strides = [1, 1]} : vector<16x22xf32> to vector<16x1xf32>
    %180 = vector.shape_cast %177 : vector<16x256xf32> to vector<1x16x256xf32>
    %cst_54 = arith.constant dense<0.000000e+00> : vector<1xf32>
    %181 = vector.multi_reduction <add>, %180, %cst_54 [1, 2] : vector<1x16x256xf32> to vector<1xf32>
    %182 = vector.shape_cast %181 : vector<1xf32> to vector<1x1x1xf32>
    %183 = vector.extract %182[0, 0, 0] : f32 from vector<1x1x1xf32>
    %184 = vector.broadcast %183 : f32 to vector<1x1xf32>
    %cst_55 = arith.constant 4.096000e+03 : f32
    %185 = vector.broadcast %cst_55 : f32 to vector<1x1xf32>
    %186 = arith.divf %184, %185 : vector<1x1xf32>
    %187 = vector.broadcast %186 : vector<1x1xf32> to vector<16x256xf32>
    %188 = arith.subf %177, %187 : vector<16x256xf32>
    %189 = arith.mulf %188, %188 : vector<16x256xf32>
    %190 = vector.shape_cast %189 : vector<16x256xf32> to vector<1x16x256xf32>
    %cst_56 = arith.constant dense<0.000000e+00> : vector<1xf32>
    %191 = vector.multi_reduction <add>, %190, %cst_56 [1, 2] : vector<1x16x256xf32> to vector<1xf32>
    %192 = vector.shape_cast %191 : vector<1xf32> to vector<1x1x1xf32>
    %193 = vector.extract %192[0, 0, 0] : f32 from vector<1x1x1xf32>
    %194 = vector.broadcast %193 : f32 to vector<1x1xf32>
    %cst_57 = arith.constant 4.096000e+03 : f32
    %195 = vector.broadcast %cst_57 : f32 to vector<1x1xf32>
    %196 = arith.divf %194, %195 : vector<1x1xf32>
    %197 = vector.broadcast %186 : vector<1x1xf32> to vector<16x256xf32>
    %198 = arith.subf %177, %197 : vector<16x256xf32>
    %cst_58 = arith.constant 9.99999974E-6 : f32
    %199 = vector.broadcast %cst_58 : f32 to vector<1x1xf32>
    %200 = arith.addf %196, %199 : vector<1x1xf32>
    %201 = math.rsqrt %200 : vector<1x1xf32>
    %202 = vector.broadcast %201 : vector<1x1xf32> to vector<16x256xf32>
    %203 = arith.mulf %198, %202 : vector<16x256xf32>
    %204 = vector.broadcast %178 : vector<16x1xf32> to vector<16x256xf32>
    %205 = arith.mulf %203, %204 : vector<16x256xf32>
    %206 = vector.broadcast %179 : vector<16x1xf32> to vector<16x256xf32>
    %207 = arith.addf %205, %206 : vector<16x256xf32>
    %cst_59 = arith.constant 0.000000e+00 : f32
    %208 = vector.broadcast %cst_59 : f32 to vector<16x256xf32>
    %209 = arith.cmpf oge, %207, %208 : vector<16x256xf32>
    %cst_60 = arith.constant 0.00999999977 : f32
    %210 = vector.broadcast %cst_60 : f32 to vector<16x256xf32>
    %211 = arith.mulf %210, %207 : vector<16x256xf32>
    %212 = arith.select %209, %207, %211 : vector<16x256xi1>, vector<16x256xf32>
    %213 = vector.extract_strided_slice %7 {offsets = [0, 0], sizes = [2, 1], strides = [1, 1]} : vector<2x3xf32> to vector<2x1xf32>
    %c0_61 = arith.constant 0 : index
    %c0_62 = arith.constant 0 : index
    %214 = vector.load %arg9[%c0_61, %c0_62] : memref<2x16xbf16, #tpu.memory_space<vmem>>, vector<2x16xbf16>
    %215 = arith.truncf %89 : vector<16x256xf32> to vector<16x256xbf16>
    %cst_63 = arith.constant dense<0.000000e+00> : vector<2x256xf32>
    %216 = tpu.matmul %214, %215, %cst_63 {dimension_numbers = #tpu.dot_dimension_numbers<[1], [0], [0], [1], [0, 0, 1, 1], [], []>} : vector<2x16xbf16>, vector<16x256xbf16>, vector<2x256xf32> -> vector<2x256xf32>
    %217 = vector.broadcast %213 : vector<2x1xf32> to vector<2x256xf32>
    %218 = arith.addf %216, %217 : vector<2x256xf32>
    %219 = vector.extract_strided_slice %7 {offsets = [0, 1], sizes = [2, 1], strides = [1, 1]} : vector<2x3xf32> to vector<2x1xf32>
    %220 = vector.extract_strided_slice %7 {offsets = [0, 2], sizes = [2, 1], strides = [1, 1]} : vector<2x3xf32> to vector<2x1xf32>
    %221 = vector.shape_cast %218 : vector<2x256xf32> to vector<1x2x256xf32>
    %cst_64 = arith.constant dense<0.000000e+00> : vector<1xf32>
    %222 = vector.multi_reduction <add>, %221, %cst_64 [1, 2] : vector<1x2x256xf32> to vector<1xf32>
    %223 = vector.shape_cast %222 : vector<1xf32> to vector<1x1x1xf32>
    %224 = vector.extract %223[0, 0, 0] : f32 from vector<1x1x1xf32>
    %225 = vector.broadcast %224 : f32 to vector<1x1xf32>
    %cst_65 = arith.constant 5.120000e+02 : f32
    %226 = vector.broadcast %cst_65 : f32 to vector<1x1xf32>
    %227 = arith.divf %225, %226 : vector<1x1xf32>
    %228 = vector.broadcast %227 : vector<1x1xf32> to vector<2x256xf32>
    %229 = arith.subf %218, %228 : vector<2x256xf32>
    %230 = arith.mulf %229, %229 : vector<2x256xf32>
    %231 = vector.shape_cast %230 : vector<2x256xf32> to vector<1x2x256xf32>
    %cst_66 = arith.constant dense<0.000000e+00> : vector<1xf32>
    %232 = vector.multi_reduction <add>, %231, %cst_66 [1, 2] : vector<1x2x256xf32> to vector<1xf32>
    %233 = vector.shape_cast %232 : vector<1xf32> to vector<1x1x1xf32>
    %234 = vector.extract %233[0, 0, 0] : f32 from vector<1x1x1xf32>
    %235 = vector.broadcast %234 : f32 to vector<1x1xf32>
    %cst_67 = arith.constant 5.120000e+02 : f32
    %236 = vector.broadcast %cst_67 : f32 to vector<1x1xf32>
    %237 = arith.divf %235, %236 : vector<1x1xf32>
    %238 = vector.broadcast %227 : vector<1x1xf32> to vector<2x256xf32>
    %239 = arith.subf %218, %238 : vector<2x256xf32>
    %cst_68 = arith.constant 9.99999974E-6 : f32
    %240 = vector.broadcast %cst_68 : f32 to vector<1x1xf32>
    %241 = arith.addf %237, %240 : vector<1x1xf32>
    %242 = math.rsqrt %241 : vector<1x1xf32>
    %243 = vector.broadcast %242 : vector<1x1xf32> to vector<2x256xf32>
    %244 = arith.mulf %239, %243 : vector<2x256xf32>
    %245 = vector.broadcast %219 : vector<2x1xf32> to vector<2x256xf32>
    %246 = arith.mulf %244, %245 : vector<2x256xf32>
    %247 = vector.broadcast %220 : vector<2x1xf32> to vector<2x256xf32>
    %248 = arith.addf %246, %247 : vector<2x256xf32>
    %cst_69 = arith.constant 0.000000e+00 : f32
    %249 = vector.broadcast %cst_69 : f32 to vector<2x256xf32>
    %250 = arith.cmpf oge, %248, %249 : vector<2x256xf32>
    %cst_70 = arith.constant 0.00999999977 : f32
    %251 = vector.broadcast %cst_70 : f32 to vector<2x256xf32>
    %252 = arith.mulf %251, %248 : vector<2x256xf32>
    %253 = arith.select %250, %248, %252 : vector<2x256xi1>, vector<2x256xf32>
    %254 = vector.extract_strided_slice %6 {offsets = [0, 15], sizes = [16, 1], strides = [1, 1]} : vector<16x22xf32> to vector<16x1xf32>
    %c0_71 = arith.constant 0 : index
    %c0_72 = arith.constant 0 : index
    %255 = vector.load %arg10[%c0_71, %c0_72] : memref<16x2xbf16, #tpu.memory_space<vmem>>, vector<16x2xbf16>
    %256 = arith.truncf %253 : vector<2x256xf32> to vector<2x256xbf16>
    %cst_73 = arith.constant dense<0.000000e+00> : vector<16x256xf32>
    %257 = tpu.matmul %255, %256, %cst_73 {dimension_numbers = #tpu.dot_dimension_numbers<[1], [0], [0], [1], [0, 0, 1, 1], [], []>} : vector<16x2xbf16>, vector<2x256xbf16>, vector<16x256xf32> -> vector<16x256xf32>
    %258 = vector.broadcast %254 : vector<16x1xf32> to vector<16x256xf32>
    %259 = arith.addf %257, %258 : vector<16x256xf32>
    %260 = vector.extract_strided_slice %6 {offsets = [0, 16], sizes = [16, 1], strides = [1, 1]} : vector<16x22xf32> to vector<16x1xf32>
    %261 = vector.extract_strided_slice %6 {offsets = [0, 17], sizes = [16, 1], strides = [1, 1]} : vector<16x22xf32> to vector<16x1xf32>
    %262 = vector.shape_cast %259 : vector<16x256xf32> to vector<1x16x256xf32>
    %cst_74 = arith.constant dense<0.000000e+00> : vector<1xf32>
    %263 = vector.multi_reduction <add>, %262, %cst_74 [1, 2] : vector<1x16x256xf32> to vector<1xf32>
    %264 = vector.shape_cast %263 : vector<1xf32> to vector<1x1x1xf32>
    %265 = vector.extract %264[0, 0, 0] : f32 from vector<1x1x1xf32>
    %266 = vector.broadcast %265 : f32 to vector<1x1xf32>
    %cst_75 = arith.constant 4.096000e+03 : f32
    %267 = vector.broadcast %cst_75 : f32 to vector<1x1xf32>
    %268 = arith.divf %266, %267 : vector<1x1xf32>
    %269 = vector.broadcast %268 : vector<1x1xf32> to vector<16x256xf32>
    %270 = arith.subf %259, %269 : vector<16x256xf32>
    %271 = arith.mulf %270, %270 : vector<16x256xf32>
    %272 = vector.shape_cast %271 : vector<16x256xf32> to vector<1x16x256xf32>
    %cst_76 = arith.constant dense<0.000000e+00> : vector<1xf32>
    %273 = vector.multi_reduction <add>, %272, %cst_76 [1, 2] : vector<1x16x256xf32> to vector<1xf32>
    %274 = vector.shape_cast %273 : vector<1xf32> to vector<1x1x1xf32>
    %275 = vector.extract %274[0, 0, 0] : f32 from vector<1x1x1xf32>
    %276 = vector.broadcast %275 : f32 to vector<1x1xf32>
    %cst_77 = arith.constant 4.096000e+03 : f32
    %277 = vector.broadcast %cst_77 : f32 to vector<1x1xf32>
    %278 = arith.divf %276, %277 : vector<1x1xf32>
    %279 = vector.broadcast %268 : vector<1x1xf32> to vector<16x256xf32>
    %280 = arith.subf %259, %279 : vector<16x256xf32>
    %cst_78 = arith.constant 9.99999974E-6 : f32
    %281 = vector.broadcast %cst_78 : f32 to vector<1x1xf32>
    %282 = arith.addf %278, %281 : vector<1x1xf32>
    %283 = math.rsqrt %282 : vector<1x1xf32>
    %284 = vector.broadcast %283 : vector<1x1xf32> to vector<16x256xf32>
    %285 = arith.mulf %280, %284 : vector<16x256xf32>
    %286 = vector.broadcast %260 : vector<16x1xf32> to vector<16x256xf32>
    %287 = arith.mulf %285, %286 : vector<16x256xf32>
    %288 = vector.broadcast %261 : vector<16x1xf32> to vector<16x256xf32>
    %289 = arith.addf %287, %288 : vector<16x256xf32>
    %cst_79 = arith.constant 0.000000e+00 : f32
    %290 = vector.broadcast %cst_79 : f32 to vector<16x256xf32>
    %291 = arith.subf %290, %289 : vector<16x256xf32>
    %292 = math.exp %291 : vector<16x256xf32>
    %cst_80 = arith.constant 1.000000e+00 : f32
    %293 = vector.broadcast %cst_80 : f32 to vector<16x256xf32>
    %294 = arith.addf %293, %292 : vector<16x256xf32>
    %cst_81 = arith.constant 1.000000e+00 : f32
    %295 = vector.broadcast %cst_81 : f32 to vector<16x256xf32>
    %296 = arith.divf %295, %294 : vector<16x256xf32>
    %cst_82 = arith.constant 9.99999997E-7 : f32
    %cst_83 = arith.constant 0.999998986 : f32
    %297 = vector.broadcast %cst_82 : f32 to vector<16x256xf32>
    %298 = arith.maximumf %297, %296 : vector<16x256xf32>
    %299 = vector.broadcast %cst_83 : f32 to vector<16x256xf32>
    %300 = arith.minimumf %299, %298 : vector<16x256xf32>
    %301 = arith.mulf %89, %300 : vector<16x256xf32>
    %cst_84 = arith.constant 1.000000e+00 : f32
    %302 = vector.broadcast %cst_84 : f32 to vector<16x256xf32>
    %303 = arith.subf %302, %300 : vector<16x256xf32>
    %304 = arith.mulf %171, %303 : vector<16x256xf32>
    %305 = vector.extract_strided_slice %6 {offsets = [0, 18], sizes = [16, 1], strides = [1, 1]} : vector<16x22xf32> to vector<16x1xf32>
    %306 = vector.broadcast %305 : vector<16x1xf32> to vector<16x256xf32>
    %307 = arith.mulf %301, %306 : vector<16x256xf32>
    %308 = vector.extract_strided_slice %6 {offsets = [0, 19], sizes = [16, 1], strides = [1, 1]} : vector<16x22xf32> to vector<16x1xf32>
    %309 = vector.broadcast %308 : vector<16x1xf32> to vector<16x256xf32>
    %310 = arith.mulf %304, %309 : vector<16x256xf32>
    %311 = arith.addf %307, %310 : vector<16x256xf32>
    %312 = vector.extract_strided_slice %6 {offsets = [0, 20], sizes = [16, 1], strides = [1, 1]} : vector<16x22xf32> to vector<16x1xf32>
    %313 = vector.broadcast %312 : vector<16x1xf32> to vector<16x256xf32>
    %314 = arith.mulf %212, %313 : vector<16x256xf32>
    %315 = arith.addf %311, %314 : vector<16x256xf32>
    %316 = vector.extract_strided_slice %6 {offsets = [0, 21], sizes = [16, 1], strides = [1, 1]} : vector<16x22xf32> to vector<16x1xf32>
    %317 = vector.broadcast %316 : vector<16x1xf32> to vector<16x256xf32>
    %318 = arith.addf %315, %317 : vector<16x256xf32>
    %cst_85 = arith.constant -1.000000e+01 : f32
    %cst_86 = arith.constant 1.000000e+01 : f32
    %319 = vector.broadcast %cst_85 : f32 to vector<16x256xf32>
    %320 = arith.maximumf %319, %318 : vector<16x256xf32>
    %321 = vector.broadcast %cst_86 : f32 to vector<16x256xf32>
    %322 = arith.minimumf %321, %320 : vector<16x256xf32>
    %cst_87 = arith.constant 0.000000e+00 : f32
    %323 = vector.broadcast %cst_87 : f32 to vector<16x256xf32>
    %324 = arith.subf %323, %322 : vector<16x256xf32>
    %325 = math.exp %324 : vector<16x256xf32>
    %cst_88 = arith.constant 1.000000e+00 : f32
    %326 = vector.broadcast %cst_88 : f32 to vector<16x256xf32>
    %327 = arith.addf %326, %325 : vector<16x256xf32>
    %cst_89 = arith.constant 1.000000e+00 : f32
    %328 = vector.broadcast %cst_89 : f32 to vector<16x256xf32>
    %329 = arith.divf %328, %327 : vector<16x256xf32>
    %330 = arith.mulf %304, %329 : vector<16x256xf32>
    %cst_90 = arith.constant 1.000000e+00 : f32
    %331 = vector.broadcast %cst_90 : f32 to vector<16x256xf32>
    %332 = arith.subf %331, %329 : vector<16x256xf32>
    %333 = arith.mulf %301, %332 : vector<16x256xf32>
    %334 = arith.addf %330, %333 : vector<16x256xf32>
    %c0_91 = arith.constant 0 : index
    %c0_92 = arith.constant 0 : index
    %c0_93 = arith.constant 0 : index
    %335 = vector.load %arg13[%c0_91, %c0_92, %c0_93] : memref<1x16x256xf32, #tpu.memory_space<vmem>>, vector<1x16x256xf32>
    %336 = vector.shape_cast %335 : vector<1x16x256xf32> to vector<16x256xf32>
    %337 = vector.shape_cast %334 : vector<16x256xf32> to vector<1x16x256xf32>
    tpu.vector_store %arg13[%c0_91, %c0_92, %c0_93], %337 {strides = array<i32>} : memref<1x16x256xf32, #tpu.memory_space<vmem>>, vector<1x16x256xf32>,
    return
  }
  func.func @transform_0(%arg0: i32) -> (i32, i32, i32) {
    %c0_i32 = arith.constant 0 : i32
    %c0_i32_0 = arith.constant 0 : i32
    %c0_i32_1 = arith.constant 0 : i32
    return %arg0, %c0_i32, %c0_i32_0 : i32, i32, i32
  }
  func.func @transform_1(%arg0: i32) -> (i32, i32, i32) {
    %c0_i32 = arith.constant 0 : i32
    %c0_i32_0 = arith.constant 0 : i32
    %c0_i32_1 = arith.constant 0 : i32
    return %arg0, %c0_i32, %c0_i32_0 : i32, i32, i32
  }
  func.func @transform_2(%arg0: i32) -> (i32, i32, i32) {
    %c0_i32 = arith.constant 0 : i32
    %c0_i32_0 = arith.constant 0 : i32
    %c0_i32_1 = arith.constant 0 : i32
    return %arg0, %c0_i32, %c0_i32_0 : i32, i32, i32
  }
  func.func @transform_3(%arg0: i32) -> (i32, i32) {
    %c0_i32 = arith.constant 0 : i32
    %c0_i32_0 = arith.constant 0 : i32
    %c0_i32_1 = arith.constant 0 : i32
    return %c0_i32, %c0_i32_0 : i32, i32
  }
  func.func @transform_4(%arg0: i32) -> (i32, i32) {
    %c0_i32 = arith.constant 0 : i32
    %c0_i32_0 = arith.constant 0 : i32
    %c0_i32_1 = arith.constant 0 : i32
    return %c0_i32, %c0_i32_0 : i32, i32
  }
  func.func @transform_5(%arg0: i32) -> (i32, i32) {
    %c0_i32 = arith.constant 0 : i32
    %c0_i32_0 = arith.constant 0 : i32
    %c0_i32_1 = arith.constant 0 : i32
    return %c0_i32, %c0_i32_0 : i32, i32
  }
  func.func @transform_6(%arg0: i32) -> (i32, i32) {
    %c0_i32 = arith.constant 0 : i32
    %c0_i32_0 = arith.constant 0 : i32
    %c0_i32_1 = arith.constant 0 : i32
    return %c0_i32, %c0_i32_0 : i32, i32
  }
  func.func @transform_7(%arg0: i32) -> (i32, i32) {
    %c0_i32 = arith.constant 0 : i32
    %c0_i32_0 = arith.constant 0 : i32
    %c0_i32_1 = arith.constant 0 : i32
    return %c0_i32, %c0_i32_0 : i32, i32
  }
  func.func @transform_8(%arg0: i32) -> (i32, i32) {
    %c0_i32 = arith.constant 0 : i32
    %c0_i32_0 = arith.constant 0 : i32
    %c0_i32_1 = arith.constant 0 : i32
    return %c0_i32, %c0_i32_0 : i32, i32
  }
  func.func @transform_9(%arg0: i32) -> (i32, i32) {
    %c0_i32 = arith.constant 0 : i32
    %c0_i32_0 = arith.constant 0 : i32
    %c0_i32_1 = arith.constant 0 : i32
    return %c0_i32, %c0_i32_0 : i32, i32
  }
  func.func @transform_10(%arg0: i32) -> (i32, i32) {
    %c0_i32 = arith.constant 0 : i32
    %c0_i32_0 = arith.constant 0 : i32
    %c0_i32_1 = arith.constant 0 : i32
    return %c0_i32, %c0_i32_0 : i32, i32
  }
  func.func @transform_11(%arg0: i32) -> (i32, i32) {
    %c0_i32 = arith.constant 0 : i32
    %c0_i32_0 = arith.constant 0 : i32
    %c0_i32_1 = arith.constant 0 : i32
    return %c0_i32, %c0_i32_0 : i32, i32
  }
  func.func @transform_12(%arg0: i32) -> (i32, i32, i32) {
    %c0_i32 = arith.constant 0 : i32
    %c0_i32_0 = arith.constant 0 : i32
    %c0_i32_1 = arith.constant 0 : i32
    return %arg0, %c0_i32, %c0_i32_0 : i32, i32, i32
  }
}

</mosaic_0001>

<bundles_post_ra>
// kernel: _lambda_.1
= control target key start
LH: loop header
LB: loop body
LE: loop exit
PB: predicated region body
PF: predicated region fallthrough
CT: control target
= control target key end

     0   :  { %s2080_s21 = smov 0   ;;  %s2591_s0 = inlined_call_operand.vmem [shape: f32[2,4,256], index: 0, kind: input, shape index: {}]   ;;  %s2592_s1 = inlined_call_operand.vmem [shape: f32[2,4,256], index: 1, kind: input, shape index: {}]   ;;  %s2593_s2 = inlined_call_operand.vmem [shape: f32[2,3,256], index: 2, kind: input, shape index: {}]   ;;  %s2594_s3 = inlined_call_operand.vmem [shape: bf16[16,4], index: 3, kind: input, shape index: {}]   ;;  %s2595_s4 = inlined_call_operand.vmem [shape: bf16[16,16], index: 4, kind: input, shape index: {}]   ;;  %s2596_s5 = inlined_call_operand.vmem [shape: bf16[16,4], index: 5, kind: input, shape index: {}]   ;;  %s2597_s6 = inlined_call_operand.vmem [shape: bf16[16,16], index: 6, kind: input, shape index: {}]   ;;  %s2598_s7 = inlined_call_operand.vmem [shape: bf16[16,3], index: 7, kind: input, shape index: {}]   ;;  %s2599_s8 = inlined_call_operand.vmem [shape: bf16[2,16], index: 8, kind: input, shape index: {}]   ;;  %s2600_s9 = inlined_call_operand.vmem [shape: bf16[16,2], index: 9, kind: input, shape index: {}]   ;;  %s2601_s10 = inlined_call_operand.vmem [shape: f32[16,22], index: 10, kind: input, shape index: {}]   ;;  %s2602_s11 = inlined_call_operand.vmem [shape: f32[2,3], index: 11, kind: input, shape index: {}]   ;;  %s2603_s12 = inlined_call_operand.vmem [shape: f32[2,16,256], index: 12, kind: output, shape index: {}]  }
   0x1 LB: > { %s1760_s22 = sadd.s32 4294967295, %s1988_s21   ;;  %p1764_p0 = scmp.ge.s32.totalorder %s1988_s21, 1  ;;  %s1988_s21 = sphi %s2080_s21, %s22_s21  }
   0x2   : > { %p382_p1 = scmp.lt.s32.totalorder %s1988_s21, 3 }
   0x4   : > { %p383_p2 = pnand %p1764_p0, %p382_p1 }
   0x5   : > { %p434_p3 = scmp.lt.s32.totalorder (!%p383_p2), %s1760_s22, 1 }
   0x6   : > { %386 = sbr.rel (%p383_p2) target bundleno = 2880 (0xb40), region = 68 }
   0xb   : > { %v2091_v0 = vld [vmem:[%s2601_s10] sm:$0xff]  ;;  %v1990_v1 = vmov 0   ;;  %s2611_s22 = smov (!%p434_p3, %s1760_s22), 1  ;;  %v2107_v3 = vld [vmem:[%s2601_s10 + $0x8] sm:$0xff]  ;;  %vm490_vm0 = vcmask 1041408   ;;  %vm486_vm1 = vcmask 31744  }
   0xc   : > { %1888 = vset.pattern.permute.xlu0 %v1990_v1  ;;  %s2098_s25 = sshll.u32 %s2611_s22, 3  ;;  %v1821_v11 = vld [vmem:[%s2594_s3] sm:$0xff]  ;;  %v1991_v32 = vmov 4096.0   ;;  %v1992_v35 = vmov 2   ;;  %v1993_v50 = vmov 1   ;;  %vm636_vm10 = vcmask 130048  }
   0xd   : > { %473 = vperm.xlu0 %1888, %v2091_v0   ;;  %s438_s28 = scalar_lea.vmem %s2591_s0, %s2098_s25  ;;  %s443_s15 = scalar_lea.vmem %s2592_s1, %s2098_s25  ;;  %1930 = vrcp.f32 %v1991_v32  ;;  %1891 = vset.pattern.permute.xlu1 %v1992_v35 }
   0xe   : > { %v455_v2 = vld [vmem:[%s438_s28] sm:$0xff]  ;;  %1889 = vset.pattern.permute.xlu2 %v1993_v50  ;;  %s448_s27 = scalar_lea.vmem %s2593_s2, %s2098_s25  ;;  %s1820_s23 = sshll.u32 %s2611_s22, 5 }
   0xf   : > { %464 = vst [vmem:[#allocation1] ss:$2 sm:$0xff] %v455_v2  ;;  %v456_v4 = vld [vmem:[%s443_s15] sm:$0xff]  ;;  %584 = vperm.xlu2 %1889, %v2091_v0   ;;  %v1994_v2 = vmov 3  }
  0x13   : > { %v1931_v33 = vpop.eup %1930 }
  0x14   : > { %v539_v34 = vmul.f32 4096.0, %v1931_v33  ;;  %vm543_vm2 = vweird.f32 %v1931_v33 }
  0x15   : > { %478 = vperm.xlu0 %1888, %v2107_v3  }
  0x16   : > { %v465_v5 = vld.sshfl [vmem:[#allocation1] sm:$0xff pattern:$0x75316420]  ;;  %v466_v6 = vld.sshfl [vmem:[#allocation1 + $0x8] sm:$0xff pattern:$0x75316420] }
  0x17   : > { %v469_v7 = vpack.c.bf16 %v465_v5, %v465_v5  ;;  %v470_v8 = vpack.c.bf16 %v466_v6, %v466_v6  ;;  %758 = vst [vmem:[#allocation1] ss:$2 sm:$0xff] %v456_v4  ;;  %v540_v36 = vsub.f32 1.0, %v539_v34  ;;  %588 = vperm.xlu2 %1889, %v2107_v3  }
  0x19   : > { %v492_v9 = vsel %vm490_vm0, %v469_v7, 0  ;;  %v495_v10 = vsel %vm490_vm0, %v470_v8, 0  ;;  %v541_v37 = vmul.f32 %v1931_v33, %v540_v36 }
  0x1a   : > { %504 = vmatpush.bf16.msra.mxu0 %v492_v9  ;;  %518 = vmatpush.bf16.msra.mxu1 %v495_v10 }
  0x1b   : > { %v542_v38 = vadd.f32 %v1931_v33, %v541_v37 }
  0x1d   : > { %1777 = vmatmul.msk.bf16.vlgmr.msra.gmra.mxu0 %vm486_vm1, %v1821_v11  ;;  %1778 = vmatmul.msk.bf16.vlgmr.msra.gmra.mxu1 %vm486_vm1, %v1821_v11  ;;  %v2124_v39 = vsel %vm543_vm2, %v1931_v33, %v542_v38  ;;  %v1822_v38 = vld [vmem:[%s2595_s4] sm:$0xff] }
  0x1e   : > { %1890 = vset.pattern.permute.xlu0 %v1992_v35 }
  0x1f   : > { %596 = vperm.xlu0 %1890, %v2091_v0   ;;  %1892 = vset.pattern.permute.xlu2 %v1994_v2 }
  0x20   : > { %624 = vperm.xlu2 %1892, %v2091_v0  }
  0x28   : > { %628 = vperm.xlu2 %1892, %v2107_v3  }
  0x69   : > { %v585_v6 = vpop.permute.xlu2 %584 }
  0x7f   : > { %v474_v12 = vpop.permute.xlu0 %473 }
  0x87   : > { %v479_v17 = vpop.permute.xlu0 %478 }
  0x9a   : > { %v506_v13 = vpop.f32.mrf.mxu0  ;;  %v520_v14 = vpop.f32.mrf.mxu1 }
  0x9b   : > { %v507_v15 = vadd.f32 %v506_v13, %v474_v12  ;;  %v521_v16 = vadd.f32 %v520_v14, %v474_v12  ;;  %v589_v14 = vpop.permute.xlu2 %588 }
  0x9d   : > { %v525_v20 = vadd.f32 %v521_v16, %v507_v15 }
  0xa2   : > { %v508_v18 = vpop.f32.mrf.mxu0  ;;  %v522_v19 = vpop.f32.mrf.mxu1 }
  0xa3   : > { %v509_v21 = vadd.f32 %v508_v18, %v479_v17  ;;  %v523_v22 = vadd.f32 %v522_v19, %v479_v17  ;;  %v597_v17 = vpop.permute.xlu0 %596 }
  0xa5   : > { %v526_v23 = vadd.f32 %v525_v20, %v509_v21 }
  0xa7   : > { %v527_v24 = vadd.f32 %v526_v23, %v523_v22 }
  0xa9   : > { %528 = vadd.xlane.f32.xlu1 %v527_v24 }
 0x11c   : > { %v529_v25 = vpop.xlane.xlu1 %528 }
 0x11d   : > { %v530_v26 = vrot.slane %v529_v25, 4 }
 0x11f   : > { %v531_v27 = vadd.f32 %v530_v26, %v529_v25 }
 0x121   : > { %v532_v28 = vrot.slane %v531_v27, 2 }
 0x123   : > { %v533_v29 = vadd.f32 %v532_v28, %v531_v27 }
 0x125   : > { %v534_v30 = vrot.slane %v533_v29, 1 }
 0x127   : > { %v535_v31 = vadd.f32 %v534_v30, %v533_v29 }
 0x129   : > { %1827 = vpush %v535_v31 }
 0x15a   : > { %s1828_s18 = spop %1827 }
 0x15b   : > { %v537_v40 = vstv %s1828_s18 }
 0x15c   : > { %v545_v41 = vmul.f32 %v2124_v39, %v537_v40  ;;  %v759_v40 = vld.sshfl [vmem:[#allocation1] sm:$0xff pattern:$0x75316420] }
 0x15e   : > { %v546_v42 = vsub.f32 %v507_v15, %v545_v41  ;;  %v547_v43 = vsub.f32 %v521_v16, %v545_v41  ;;  %v548_v44 = vsub.f32 %v509_v21, %v545_v41  ;;  %v549_v45 = vsub.f32 %v523_v22, %v545_v41  ;;  %v457_v41 = vld [vmem:[%s448_s27] sm:$0x77] }
 0x160   : > { %v550_v46 = vmul.f32 %v546_v42, %v546_v42  ;;  %v551_v47 = vmul.f32 %v547_v43, %v547_v43  ;;  %v552_v48 = vmul.f32 %v548_v44, %v548_v44  ;;  %v553_v51 = vmul.f32 %v549_v45, %v549_v45 }
 0x162   : > { %v554_v49 = vadd.f32 %v551_v47, %v550_v46  ;;  %v1823_v47 = vld [vmem:[%s2596_s5] sm:$0xff] }
 0x164   : > { %v555_v52 = vadd.f32 %v554_v49, %v552_v48  ;;  %v625_v49 = vpop.permute.xlu2 %624 }
 0x166   : > { %v556_v53 = vadd.f32 %v555_v52, %v553_v51 }
 0x168   : > { %557 = vadd.xlane.f32.xlu1 %v556_v53 }
 0x181   : > { %600 = vperm.xlu1 %1891, %v2107_v3  }
 0x1db   : > { %v558_v54 = vpop.xlane.xlu1 %557 }
 0x1dc   : > { %v559_v55 = vrot.slane %v558_v54, 4 }
 0x1de   : > { %v560_v56 = vadd.f32 %v559_v55, %v558_v54  ;;  %v629_v55 = vpop.permute.xlu2 %628 }
 0x1e0   : > { %v561_v57 = vrot.slane %v560_v56, 2 }
 0x1e2   : > { %v562_v58 = vadd.f32 %v561_v57, %v560_v56 }
 0x1e4   : > { %v563_v59 = vrot.slane %v562_v58, 1 }
 0x1e6   : > { %v564_v60 = vadd.f32 %v563_v59, %v562_v58 }
 0x1e8   : > { %1829 = vpush %v564_v60 }
 0x1f3   : > { %v601_v18 = vpop.permute.xlu1 %600 }
 0x219   : > { %s1830_s19 = spop %1829 }
 0x21a   : > { %v566_v61 = vstv %s1830_s19 }
 0x21b   : > { %v567_v62 = vmul.f32 %v566_v61, %v2124_v39 }
 0x21d   : > { %v568_v63 = vadd.f32 1e-05, %v567_v62 }
 0x21f   : > { %1932 = vrsqrt.f32 %v568_v63  ;;  %vm575_vm4 = vweird.f32 %v568_v63 }
 0x225   : > { %v1933_v4 = vpop.eup %1932 }
 0x226   : > { %v570_v5 = vmul.f32 %v1933_v4, %v568_v63  ;;  %vm576_vm3 = vweird.f32 %v1933_v4 }
 0x227   : > { %vm577_vm5 = vmor %vm575_vm4, %vm576_vm3 }
 0x228   : > { %v571_v7 = vmul.f32 %v1933_v4, %v570_v5 }
 0x22a   : > { %v572_v8 = vmul.f32 0.5, %v571_v7 }
 0x22c   : > { %v573_v9 = vsub.f32 1.5, %v572_v8 }
 0x22e   : > { %v574_v10 = vmul.f32 %v1933_v4, %v573_v9 }
 0x230   : > { %v578_v11 = vsel %vm577_vm5, %v1933_v4, %v574_v10 }
 0x231   : > { %v579_v12 = vmul.f32 %v578_v11, %v546_v42  ;;  %v580_v13 = vmul.f32 %v578_v11, %v547_v43  ;;  %v581_v15 = vmul.f32 %v578_v11, %v548_v44  ;;  %v582_v16 = vmul.f32 %v578_v11, %v549_v45  ;;  %v760_v43 = vld.sshfl [vmem:[#allocation1 + $0x8] sm:$0xff pattern:$0x75316420] }
 0x232   : > { %v763_v42 = vpack.c.bf16 %v759_v40, %v759_v40  ;;  %v764_v44 = vpack.c.bf16 %v760_v43, %v760_v43  ;;  %1040 = vst [vmem:[#allocation1] ss:$2 sm:$0xff] %v457_v41  ;;  %v1995_v45 = vmov 6   ;;  %v1999_v40 = vmov 4  }
 0x233   : > { %v591_v19 = vmul.f32 %v585_v6, %v579_v12  ;;  %v592_v20 = vmul.f32 %v585_v6, %v580_v13  ;;  %v593_v21 = vmul.f32 %v589_v14, %v581_v15  ;;  %v594_v22 = vmul.f32 %v589_v14, %v582_v16  ;;  %1893 = vset.pattern.permute.xlu2 %v1995_v45 }
 0x234   : > { %v782_v46 = vsel %vm490_vm0, %v763_v42, 0  ;;  %766 = vperm.xlu2 %1893, %v2091_v0   ;;  %v785_v48 = vsel %vm490_vm0, %v764_v44, 0 }
 0x235   : > { %v603_v23 = vadd.f32 %v597_v17, %v591_v19  ;;  %v604_v24 = vadd.f32 %v597_v17, %v592_v20  ;;  %v605_v25 = vadd.f32 %v601_v18, %v593_v21  ;;  %v606_v26 = vadd.f32 %v601_v18, %v594_v22  ;;  %794 = vmatpush.bf16.msrb.mxu0 %v782_v46 }
 0x236   : > { %808 = vmatpush.bf16.msrb.mxu1 %v785_v48  ;;  %v1996_v22 = vmov 7  }
 0x237   : > { %vm607_vm6 = vcmp.ge.f32.partialorder %v603_v23, 0.0  ;;  %vm609_vm7 = vcmp.ge.f32.partialorder %v605_v25, 0.0  ;;  %v611_v27 = vmul.f32 0.01, %v603_v23  ;;  %v613_v28 = vmul.f32 0.01, %v605_v25  ;;  %1895 = vset.pattern.permute.xlu1 %v1996_v22  ;;  %1894 = vset.pattern.permute.xlu0 %v1996_v22 }
 0x238   : > { %vm608_vm8 = vcmp.ge.f32.partialorder %v604_v24, 0.0  ;;  %vm610_vm9 = vcmp.ge.f32.partialorder %v606_v26, 0.0  ;;  %v612_v29 = vmul.f32 0.01, %v604_v24  ;;  %v614_v30 = vmul.f32 0.01, %v606_v26  ;;  %1789 = vmatmul.msk.bf16.vlgmr.msrb.gmra.mxu0 %vm486_vm1, %v1823_v47 }
 0x239   : > { %v615_v31 = vsel %vm607_vm6, %v603_v23, %v611_v27  ;;  %v617_v32 = vsel %vm609_vm7, %v605_v25, %v613_v28  ;;  %1790 = vmatmul.msk.bf16.vlgmr.msrb.gmra.mxu1 %vm486_vm1, %v1823_v47 }
 0x23a   : > { %v621_v33 = vpack.c.bf16 %v617_v32, %v615_v31  ;;  %v616_v34 = vsel %vm608_vm8, %v604_v24, %v612_v29  ;;  %v618_v36 = vsel %vm610_vm9, %v606_v26, %v614_v30 }
 0x23b   : > { %v622_v37 = vpack.c.bf16 %v618_v36, %v616_v34 }
 0x23c   : > { %647 = vmatpush.bf16.msra.mxu2 %v621_v33  ;;  %770 = vperm.xlu2 %1893, %v2107_v3   ;;  %v1997_v33 = vmov 8  }
 0x23d   : > { %661 = vmatpush.bf16.msra.mxu3 %v622_v37 }
 0x23f   : > { %1783 = vmatmul.msk.bf16.vlgmr.msra.gmra.mxu2 %vm636_vm10, %v1822_v38 }
 0x240   : > { %1784 = vmatmul.msk.bf16.vlgmr.msra.gmra.mxu3 %vm636_vm10, %v1822_v38  ;;  %v1998_v38 = vmov 9  }
 0x244   : > { %1896 = vset.pattern.permute.xlu2 %v1997_v33 }
 0x28e   : > { %v767_v63 = vpop.permute.xlu2 %766 }
 0x296   : > { %v771_v7 = vpop.permute.xlu2 %770 }
 0x2b5   : > { %v796_v2 = vpop.f32.mrf.mxu0 }
 0x2b6   : > { %v810_v4 = vpop.f32.mrf.mxu1  ;;  %v2152_v5 = vadd.f32 %v796_v2, %v767_v63 }
 0x2b7   : > { %v2154_v6 = vadd.f32 %v810_v4, %v767_v63 }
 0x2b9   : > { %v815_v8 = vadd.f32 %v2154_v6, %v2152_v5 }
 0x2bd   : > { %v798_v9 = vpop.f32.mrf.mxu0 }
 0x2be   : > { %v2158_v10 = vadd.f32 %v798_v9, %v771_v7  ;;  %v812_v11 = vpop.f32.mrf.mxu1 }
 0x2bf   : > { %v2160_v12 = vadd.f32 %v812_v11, %v771_v7  ;;  %v2000_v7 = vmov 5  }
 0x2c0   : > { %v816_v13 = vadd.f32 %v815_v8, %v2158_v10 }
 0x2c2   : > { %v649_v51 = vpop.f32.mrf.mxu2  ;;  %v817_v14 = vadd.f32 %v816_v13, %v2160_v12 }
 0x2c3   : > { %v663_v52 = vpop.f32.mrf.mxu3  ;;  %v650_v53 = vadd.f32 %v649_v51, %v625_v49 }
 0x2c4   : > { %v664_v54 = vadd.f32 %v663_v52, %v625_v49  ;;  %818 = vadd.xlane.f32.xlu2 %v817_v14 }
 0x2c6   : > { %v668_v57 = vadd.f32 %v664_v54, %v650_v53 }
 0x2ca   : > { %v651_v56 = vpop.f32.mrf.mxu2 }
 0x2cb   : > { %v652_v58 = vadd.f32 %v651_v56, %v629_v55  ;;  %v665_v59 = vpop.f32.mrf.mxu3 }
 0x2cc   : > { %v666_v61 = vadd.f32 %v665_v59, %v629_v55 }
 0x2cd   : > { %v669_v60 = vadd.f32 %v668_v57, %v652_v58 }
 0x2cf   : > { %v670_v62 = vadd.f32 %v669_v60, %v666_v61 }
 0x2d1   : > { %671 = vadd.xlane.f32.xlu0 %v670_v62 }
 0x2dc   : > { %879 = vperm.xlu2 %1896, %v2091_v0  }
 0x2e4   : > { %1898 = vset.pattern.permute.xlu2 %v1998_v38 }
 0x2e5   : > { %907 = vperm.xlu2 %1898, %v2091_v0  }
 0x2ed   : > { %1905 = vset.pattern.permute.xlu2 %v1990_v1 }
 0x337   : > { %v819_v41 = vpop.xlane.xlu2 %818 }
 0x338   : > { %v820_v42 = vrot.slane %v819_v41, 4 }
 0x33a   : > { %v821_v43 = vadd.f32 %v820_v42, %v819_v41 }
 0x33c   : > { %v822_v44 = vrot.slane %v821_v43, 2 }
 0x33e   : > { %v823_v1 = vadd.f32 %v822_v44, %v821_v43 }
 0x340   : > { %v824_v51 = vrot.slane %v823_v1, 1 }
 0x344   : > { %v672_v15 = vpop.xlane.xlu0 %671 }
 0x345   : > { %v673_v16 = vrot.slane %v672_v15, 4 }
 0x347   : > { %v674_v17 = vadd.f32 %v673_v16, %v672_v15 }
 0x349   : > { %v675_v18 = vrot.slane %v674_v17, 2 }
 0x34b   : > { %v676_v19 = vadd.f32 %v675_v18, %v674_v17 }
 0x34d   : > { %v677_v20 = vrot.slane %v676_v19, 1 }
 0x34f   : > { %v678_v21 = vadd.f32 %v677_v20, %v676_v19 }
 0x351   : > { %1831 = vpush %v678_v21 }
 0x382   : > { %s1832_s25 = spop %1831 }
 0x383   : > { %v680_v23 = vstv %s1832_s25 }
 0x384   : > { %v681_v24 = vmul.f32 %v680_v23, %v2124_v39 }
 0x386   : > { %v2165_v25 = vsub.f32 %v650_v53, %v681_v24  ;;  %v2167_v26 = vsub.f32 %v664_v54, %v681_v24  ;;  %v2169_v27 = vsub.f32 %v652_v58, %v681_v24  ;;  %v2171_v28 = vsub.f32 %v666_v61, %v681_v24 }
 0x387   : > { %v825_v54 = vadd.f32 %v824_v51, %v823_v1 }
 0x388   : > { %v686_v29 = vmul.f32 %v2165_v25, %v2165_v25  ;;  %v687_v30 = vmul.f32 %v2167_v26, %v2167_v26  ;;  %v688_v31 = vmul.f32 %v2169_v27, %v2169_v27  ;;  %v689_v34 = vmul.f32 %v2171_v28, %v2171_v28 }
 0x38a   : > { %v690_v32 = vadd.f32 %v687_v30, %v686_v29 }
 0x38c   : > { %v691_v36 = vadd.f32 %v690_v32, %v688_v31 }
 0x38e   : > { %v692_v37 = vadd.f32 %v691_v36, %v689_v34 }
 0x390   : > { %693 = vadd.xlane.f32.xlu1 %v692_v37 }
 0x3a9   : > { %871 = vperm.xlu1 %1895, %v2107_v3  }
 0x3b1   : > { %1897 = vset.pattern.permute.xlu1 %v1997_v33 }
 0x3b2   : > { %883 = vperm.xlu1 %1897, %v2107_v3  }
 0x3ba   : > { %1899 = vset.pattern.permute.xlu1 %v1998_v38 }
 0x3bb   : > { %911 = vperm.xlu1 %1899, %v2107_v3  }
 0x3c3   : > { %1901 = vset.pattern.permute.xlu1 %v1999_v40 }
 0x3c4   : > { %724 = vperm.xlu1 %1901, %v2107_v3  }
 0x3cc   : > { %1902 = vset.pattern.permute.xlu1 %v2000_v7 }
 0x3cd   : > { %732 = vperm.xlu1 %1902, %v2091_v0  }
 0x403   : > { %v694_v45 = vpop.xlane.xlu1 %693 }
 0x404   : > { %v695_v46 = vrot.slane %v694_v45, 4 }
 0x406   : > { %v696_v47 = vadd.f32 %v695_v46, %v694_v45 }
 0x408   : > { %v697_v48 = vrot.slane %v696_v47, 2 }
 0x40a   : > { %v698_v49 = vadd.f32 %v697_v48, %v696_v47 }
 0x40c   : > { %v699_v52 = vrot.slane %v698_v49, 1 }
 0x40e   : > { %v700_v53 = vadd.f32 %v699_v52, %v698_v49 }
 0x410   : > { %1833 = vpush %v700_v53 }
 0x411   : > { %1835 = vpush %v825_v54 }
 0x41b   : > { %v872_v18 = vpop.permute.xlu1 %871 }
 0x424   : > { %v884_v20 = vpop.permute.xlu1 %883 }
 0x42d   : > { %v2218_v24 = vpop.permute.xlu1 %911 }
 0x436   : > { %v725_v36 = vpop.permute.xlu1 %724 }
 0x43f   : > { %v733_v48 = vpop.permute.xlu1 %732 }
 0x441   : > { %s2188_s30 = spop %1833 }
 0x442   : > { %s1836_s13 = spop %1835  ;;  %v702_v15 = vstv %s2188_s30 }
 0x443   : > { %v827_v55 = vstv %s1836_s13  ;;  %v703_v16 = vmul.f32 %v702_v15, %v2124_v39 }
 0x444   : > { %v828_v56 = vmul.f32 %v827_v55, %v2124_v39 }
 0x445   : > { %v704_v17 = vadd.f32 1e-05, %v703_v16 }
 0x446   : > { %v2192_v57 = vsub.f32 %v2152_v5, %v828_v56  ;;  %v2195_v58 = vsub.f32 %v2154_v6, %v828_v56  ;;  %v2198_v59 = vsub.f32 %v2158_v10, %v828_v56  ;;  %v2201_v60 = vsub.f32 %v2160_v12, %v828_v56 }
 0x447   : > { %1934 = vrsqrt.f32 %v704_v17  ;;  %vm711_vm12 = vweird.f32 %v704_v17 }
 0x448   : > { %v833_v61 = vmul.f32 %v2192_v57, %v2192_v57  ;;  %v834_v62 = vmul.f32 %v2195_v58, %v2195_v58  ;;  %v835_v63 = vmul.f32 %v2198_v59, %v2198_v59  ;;  %v836_v4 = vmul.f32 %v2201_v60, %v2201_v60 }
 0x44a   : > { %v837_v2 = vadd.f32 %v834_v62, %v833_v61 }
 0x44c   : > { %v838_v5 = vadd.f32 %v837_v2, %v835_v63  ;;  %v880_v2 = vpop.permute.xlu2 %879 }
 0x44d   : > { %v1935_v19 = vpop.eup %1934 }
 0x44e   : > { %v839_v6 = vadd.f32 %v838_v5, %v836_v4  ;;  %v706_v21 = vmul.f32 %v1935_v19, %v704_v17  ;;  %vm712_vm11 = vweird.f32 %v1935_v19 }
 0x44f   : > { %vm713_vm13 = vmor %vm711_vm12, %vm712_vm11  ;;  %vm1064_vm11 = vcmask 1040384   ;;  %vm1060_vm12 = vcmask 23552  }
 0x450   : > { %840 = vadd.xlane.f32.xlu0 %v839_v6  ;;  %v707_v22 = vmul.f32 %v1935_v19, %v706_v21 }
 0x464   : > { %867 = vperm.xlu0 %1894, %v2091_v0  }
 0x46c   : > { %1900 = vset.pattern.permute.xlu0 %v1999_v40 }
 0x46d   : > { %720 = vperm.xlu0 %1900, %v2091_v0  }
 0x475   : > { %1903 = vset.pattern.permute.xlu0 %v2000_v7 }
 0x476   : > { %736 = vperm.xlu0 %1903, %v2107_v3  }
 0x47e   : > { %1906 = vset.pattern.permute.xlu0 %v1993_v50  ;;  %v708_v50 = vmul.f32 0.5, %v707_v22 }
 0x480   : > { %v709_v32 = vsub.f32 1.5, %v708_v50 }
 0x482   : > { %v710_v33 = vmul.f32 %v1935_v19, %v709_v32  ;;  %v1824_v32 = vld [vmem:[%s2597_s6] sm:$0xff] }
 0x484   : > { %v714_v38 = vsel %vm713_vm13, %v1935_v19, %v710_v33  ;;  %v1041_v33 = vld.sshfl [vmem:[#allocation1] sm:$0xff pattern:$0x75316420] }
 0x485   : > { %v715_v42 = vmul.f32 %v714_v38, %v2165_v25  ;;  %v717_v43 = vmul.f32 %v714_v38, %v2169_v27  ;;  %v718_v44 = vmul.f32 %v714_v38, %v2171_v28  ;;  %v716_v45 = vmul.f32 %v714_v38, %v2167_v26  ;;  %v1042_v38 = vld.sshfl [vmem:[#allocation1 + $0x8] sm:$0xff pattern:$0x75316420] }
 0x487   : > { %v729_v52 = vmul.f32 %v725_v36, %v717_v43  ;;  %v730_v53 = vmul.f32 %v725_v36, %v718_v44  ;;  %v2001_v36 = vmov 65535  }
 0x4c3   : > { %v841_v8 = vpop.xlane.xlu0 %840 }
 0x4c4   : > { %v842_v9 = vrot.slane %v841_v8, 4 }
 0x4c6   : > { %v843_v10 = vadd.f32 %v842_v9, %v841_v8 }
 0x4c8   : > { %v844_v11 = vrot.slane %v843_v10, 2 }
 0x4ca   : > { %v845_v12 = vadd.f32 %v844_v11, %v843_v10 }
 0x4cc   : > { %v846_v13 = vrot.slane %v845_v12, 1 }
 0x4ce   : > { %v847_v14 = vadd.f32 %v846_v13, %v845_v12 }
 0x4d0   : > { %1837 = vpush %v847_v14 }
 0x4d6   : > { %v868_v23 = vpop.permute.xlu0 %867 }
 0x4df   : > { %v721_v34 = vpop.permute.xlu0 %720 }
 0x4e0   : > { %v727_v47 = vmul.f32 %v721_v34, %v715_v42  ;;  %v728_v1 = vmul.f32 %v721_v34, %v716_v45  ;;  %v1045_v34 = vpack.c.bf16 %v1041_v33, %v1041_v33  ;;  %v2002_v42 = vmov 12   ;;  %v1825_v45 = vld [vmem:[%s2598_s7] sm:$0xff] }
 0x4e1   : > { %1904 = vset.pattern.permute.xlu1 %v2002_v42 }
 0x4e2   : > { %v739_v55 = vadd.f32 %v733_v48, %v727_v47  ;;  %v740_v25 = vadd.f32 %v733_v48, %v728_v1  ;;  %1048 = vperm.xlu1 %1904, %v2091_v0   ;;  %v908_v1 = vpop.permute.xlu2 %907 }
 0x4e4   : > { %vm743_vm2 = vcmp.ge.f32.partialorder %v739_v55, 0.0  ;;  %vm744_vm3 = vcmp.ge.f32.partialorder %v740_v25, 0.0  ;;  %v748_v14 = vmul.f32 0.01, %v740_v25 }
 0x4e8   : > { %v737_v51 = vpop.permute.xlu0 %736 }
 0x4e9   : > { %v741_v56 = vadd.f32 %v737_v51, %v729_v52  ;;  %v742_v27 = vadd.f32 %v737_v51, %v730_v53 }
 0x4ea   : > { %1052 = vperm.xlu1 %1904, %v2107_v3  }
 0x4eb   : > { %v749_v8 = vmul.f32 0.01, %v741_v56  ;;  %v750_v9 = vmul.f32 0.01, %v742_v27  ;;  %vm745_vm4 = vcmp.ge.f32.partialorder %v741_v56, 0.0  ;;  %vm746_vm5 = vcmp.ge.f32.partialorder %v742_v27, 0.0 }
 0x4ed   : > { %v2229_v16 = vsel %vm745_vm4, %v741_v56, %v749_v8  ;;  %v2231_v17 = vsel %vm746_vm5, %v742_v27, %v750_v9  ;;  %vm1312_vm5 = vcmask 15360  }
 0x4f2   : > { %1907 = vset.pattern.permute.xlu1 %v1992_v35 }
 0x501   : > { %s1838_s14 = spop %1837 }
 0x502   : > { %v849_v29 = vstv %s1838_s14 }
 0x503   : > { %v850_v30 = vmul.f32 %v849_v29, %v2124_v39 }
 0x505   : > { %v851_v31 = vadd.f32 1e-05, %v850_v30 }
 0x507   : > { %1936 = vrsqrt.f32 %v851_v31  ;;  %vm858_vm15 = vweird.f32 %v851_v31 }
 0x50d   : > { %v1937_v37 = vpop.eup %1936 }
 0x50e   : > { %v853_v40 = vmul.f32 %v1937_v37, %v851_v31  ;;  %vm859_vm14 = vweird.f32 %v1937_v37 }
 0x50f   : > { %vm860_vm1 = vmor %vm858_vm15, %vm859_vm14 }
 0x510   : > { %v854_v41 = vmul.f32 %v1937_v37, %v853_v40 }
 0x512   : > { %v855_v46 = vmul.f32 0.5, %v854_v41  ;;  %v1046_v41 = vpack.c.bf16 %v1042_v38, %v1042_v38 }
 0x514   : > { %v856_v49 = vsub.f32 1.5, %v855_v46 }
 0x516   : > { %v857_v54 = vmul.f32 %v1937_v37, %v856_v49 }
 0x518   : > { %v861_v61 = vsel %vm860_vm1, %v1937_v37, %v857_v54  ;;  %v1065_v37 = vsel %vm1064_vm11, 4294967295, %v2001_v36 }
 0x519   : > { %v862_v28 = vmul.f32 %v861_v61, %v2192_v57  ;;  %v863_v26 = vmul.f32 %v861_v61, %v2195_v58  ;;  %v864_v62 = vmul.f32 %v861_v61, %v2198_v59  ;;  %v865_v63 = vmul.f32 %v861_v61, %v2201_v60 }
 0x51a   : > { %v747_v57 = vmul.f32 0.01, %v739_v55  ;;  %v1066_v40 = vsel %vm490_vm0, %v1065_v37, 0 }
 0x51b   : > { %v874_v4 = vmul.f32 %v868_v23, %v862_v28  ;;  %v875_v5 = vmul.f32 %v868_v23, %v863_v26  ;;  %v876_v6 = vmul.f32 %v872_v18, %v864_v62  ;;  %v877_v7 = vmul.f32 %v872_v18, %v865_v63 }
 0x51c   : > { %v2234_v22 = vsel %vm743_vm2, %v739_v55, %v747_v57  ;;  %v2237_v23 = vsel %vm744_vm3, %v740_v25, %v748_v14  ;;  %v1068_v43 = vand.u32 %v1066_v40, %v1045_v34  ;;  %v1071_v44 = vand.u32 %v1066_v40, %v1046_v41  ;;  %v1188_v14 = vld [vmem:[%s2599_s8] sm:$0x1] }
 0x51d   : > { %v886_v10 = vadd.f32 %v880_v2, %v874_v4  ;;  %v887_v11 = vadd.f32 %v880_v2, %v875_v5  ;;  %v888_v12 = vadd.f32 %v884_v20, %v876_v6  ;;  %v889_v13 = vadd.f32 %v884_v20, %v877_v7 }
 0x51e   : > { %v1189_v30 = vpack.c.bf16 %v2229_v16, %v2234_v22  ;;  %v1190_v31 = vpack.c.bf16 %v2231_v17, %v2237_v23  ;;  %1080 = vmatpush.bf16.msra.mxu0 %v1068_v43  ;;  %1094 = vmatpush.bf16.msra.mxu1 %v1071_v44 }
 0x51f   : > { %v894_v58 = vmul.f32 0.01, %v886_v10  ;;  %v895_v59 = vmul.f32 0.01, %v887_v11  ;;  %vm890_vm6 = vcmp.ge.f32.partialorder %v886_v10, 0.0  ;;  %vm892_vm7 = vcmp.ge.f32.partialorder %v888_v12, 0.0 }
 0x520   : > { %v896_v60 = vmul.f32 0.01, %v888_v12  ;;  %vm891_vm8 = vcmp.ge.f32.partialorder %v887_v11, 0.0  ;;  %vm893_vm9 = vcmp.ge.f32.partialorder %v889_v13, 0.0  ;;  %v897_v15 = vmul.f32 0.01, %v889_v13 }
 0x521   : > { %v898_v18 = vsel %vm890_vm6, %v886_v10, %v894_v58  ;;  %v899_v19 = vsel %vm891_vm8, %v887_v11, %v895_v59  ;;  %1801 = vmatmul.msk.bf16.vlgmr.msra.gmra.mxu0 %vm1060_vm12, %v1825_v45  ;;  %1802 = vmatmul.msk.bf16.vlgmr.msra.gmra.mxu1 %vm1060_vm12, %v1825_v45  ;;  %v2276_v58 = vld [vmem:[%s2602_s11] sm:$0x3] }
 0x522   : > { %v900_v21 = vsel %vm892_vm7, %v888_v12, %v896_v60  ;;  %v901_v20 = vsel %vm893_vm9, %v889_v13, %v897_v15 }
 0x523   : > { %v904_v50 = vpack.c.bf16 %v900_v21, %v898_v18  ;;  %v905_v29 = vpack.c.bf16 %v901_v20, %v899_v19 }
 0x525   : > { %929 = vmatpush.bf16.msrb.mxu2 %v904_v50  ;;  %943 = vmatpush.bf16.msrb.mxu3 %v905_v29 }
 0x528   : > { %1795 = vmatmul.msk.bf16.vlgmr.msrb.gmra.mxu2 %vm636_vm10, %v1824_v32  ;;  %1796 = vmatmul.msk.bf16.vlgmr.msrb.gmra.mxu3 %vm636_vm10, %v1824_v32 }
 0x529   : > { %1206 = vmatpush.bf16.msra.mxu2 %v1189_v30  ;;  %1219 = vmatpush.bf16.msra.mxu3 %v1190_v31 }
 0x538   : > { %1803 = vmatmul.msk.bf16.vlgmr.msra.gmra.mxu2 %vm636_vm10, %v1188_v14  ;;  %1804 = vmatmul.msk.bf16.vlgmr.msra.gmra.mxu3 %vm636_vm10, %v1188_v14  ;;  %v2008_v14 = vmov 13  }
 0x554   : > { %v1049_v27 = vpop.permute.xlu1 %1048 }
 0x55c   : > { %v1053_v35 = vpop.permute.xlu1 %1052 }
 0x59e   : > { %v1082_v61 = vpop.f32.mrf.mxu0  ;;  %v1096_v28 = vpop.f32.mrf.mxu1 }
 0x59f   : > { %v2258_v26 = vadd.f32 %v1082_v61, %v1049_v27  ;;  %v2260_v62 = vadd.f32 %v1096_v28, %v1049_v27  ;;  %v2003_v28 = vmov 15  }
 0x5a1   : > { %v1101_v63 = vadd.f32 %v2260_v62, %v2258_v26 }
 0x5a6   : > { %v1084_v2 = vpop.f32.mrf.mxu0  ;;  %v1098_v5 = vpop.f32.mrf.mxu1 }
 0x5a7   : > { %v2264_v4 = vadd.f32 %v1084_v2, %v1053_v35  ;;  %v2266_v6 = vadd.f32 %v1098_v5, %v1053_v35 }
 0x5ab   : > { %v931_v46 = vpop.f32.mrf.mxu2  ;;  %v945_v47 = vpop.f32.mrf.mxu3 }
 0x5ac   : > { %v932_v48 = vadd.f32 %v931_v46, %v908_v1  ;;  %v946_v49 = vadd.f32 %v945_v47, %v908_v1 }
 0x5ae   : > { %v950_v53 = vadd.f32 %v946_v49, %v932_v48 }
 0x5b3   : > { %v933_v51 = vpop.f32.mrf.mxu2  ;;  %v947_v52 = vpop.f32.mrf.mxu3 }
 0x5b4   : > { %v934_v54 = vadd.f32 %v933_v51, %v2218_v24  ;;  %v948_v25 = vadd.f32 %v947_v52, %v2218_v24  ;;  %v1102_v24 = vadd.f32 %v1101_v63, %v2264_v4 }
 0x5b6   : > { %v951_v55 = vadd.f32 %v950_v53, %v934_v54  ;;  %v1103_v7 = vadd.f32 %v1102_v24, %v2266_v6 }
 0x5b8   : > { %v952_v56 = vadd.f32 %v951_v55, %v948_v25  ;;  %1104 = vadd.xlane.f32.xlu1 %v1103_v7 }
 0x5ba   : > { %953 = vadd.xlane.f32.xlu2 %v952_v56 }
 0x5bb   : > { %v1221_v51 = vpop.f32.mrf.mxu3 }
 0x5c3   : > { %v1223_v61 = vpop.f32.mrf.mxu3 }
 0x5c4   : > { %v2010_v61 = vmov 512.0  }
 0x5d2   : > { %1193 = vperm.xlu2 %1905, %v2276_v58  }
 0x5da   : > { %1908 = vset.pattern.permute.xlu2 %v2003_v28 }
 0x62b   : > { %v1105_v34 = vpop.xlane.xlu1 %1104 }
 0x62c   : > { %v1106_v36 = vrot.slane %v1105_v34, 4 }
 0x62d   : > { %v954_v8 = vpop.xlane.xlu2 %953 }
 0x62e   : > { %v955_v9 = vrot.slane %v954_v8, 4  ;;  %v1107_v37 = vadd.f32 %v1106_v36, %v1105_v34 }
 0x630   : > { %v956_v10 = vadd.f32 %v955_v9, %v954_v8  ;;  %v1108_v38 = vrot.slane %v1107_v37, 2 }
 0x632   : > { %v957_v11 = vrot.slane %v956_v10, 2  ;;  %v1109_v43 = vadd.f32 %v1108_v38, %v1107_v37 }
 0x634   : > { %v958_v12 = vadd.f32 %v957_v11, %v956_v10  ;;  %v1110_v46 = vrot.slane %v1109_v43, 1 }
 0x635   : > { %v1194_v52 = vpop.permute.xlu2 %1193 }
 0x636   : > { %v959_v13 = vrot.slane %v958_v12, 1 }
 0x638   : > { %v960_v57 = vadd.f32 %v959_v13, %v958_v12  ;;  %v2006_v13 = vmov 16  }
 0x63a   : > { %1839 = vpush %v960_v57  ;;  %v2007_v57 = vmov 17  }
 0x66b   : > { %s1840_s26 = spop %1839 }
 0x66c   : > { %v962_v59 = vstv %s1840_s26  ;;  %s453_s26 = scalar_lea.vmem %s2603_s12, %s1820_s23 }
 0x66d   : > { %v963_v60 = vmul.f32 %v962_v59, %v2124_v39  ;;  %v2343_v59 = vld [vmem:[%s2601_s10] sm:$0xff] }
 0x66f   : > { %v2282_v15 = vsub.f32 %v932_v48, %v963_v60  ;;  %v2284_v18 = vsub.f32 %v946_v49, %v963_v60  ;;  %v2286_v19 = vsub.f32 %v934_v54, %v963_v60  ;;  %v2288_v21 = vsub.f32 %v948_v25, %v963_v60  ;;  %v1208_v49 = vpop.f32.mrf.mxu2 }
 0x670   : > { %v1111_v48 = vadd.f32 %v1110_v46, %v1109_v43  ;;  %v2298_v53 = vadd.f32 %v1208_v49, %v1194_v52  ;;  %v2300_v54 = vadd.f32 %v1221_v51, %v1194_v52 }
 0x671   : > { %v968_v20 = vmul.f32 %v2282_v15, %v2282_v15  ;;  %v969_v50 = vmul.f32 %v2284_v18, %v2284_v18  ;;  %v970_v29 = vmul.f32 %v2286_v19, %v2286_v19  ;;  %v971_v31 = vmul.f32 %v2288_v21, %v2288_v21 }
 0x672   : > { %v1225_v55 = vsel %vm490_vm0, %v2298_v53, 0.0  ;;  %v1226_v25 = vsel %vm490_vm0, %v2300_v54, 0.0 }
 0x673   : > { %v972_v30 = vadd.f32 %v969_v50, %v968_v20  ;;  %v1227_v56 = vadd.f32 %v1226_v25, %v1225_v55  ;;  %v2009_v50 = vmov 14  }
 0x675   : > { %v973_v32 = vadd.f32 %v972_v30, %v970_v29 }
 0x677   : > { %v974_v33 = vadd.f32 %v973_v32, %v971_v31  ;;  %v1210_v27 = vpop.f32.mrf.mxu2 }
 0x679   : > { %975 = vadd.xlane.f32.xlu0 %v974_v33 }
 0x681   : > { %1228 = vadd.xlane.f32.xlu0 %v1227_v56 }
 0x695   : > { %1278 = vperm.xlu0 %1906, %v2276_v58  }
 0x6ec   : > { %v976_v40 = vpop.xlane.xlu0 %975 }
 0x6ed   : > { %v977_v41 = vrot.slane %v976_v40, 4 }
 0x6ef   : > { %v978_v42 = vadd.f32 %v977_v41, %v976_v40 }
 0x6f1   : > { %v979_v44 = vrot.slane %v978_v42, 2 }
 0x6f3   : > { %v980_v45 = vadd.f32 %v979_v44, %v978_v42 }
 0x6f4   : > { %v1229_v29 = vpop.xlane.xlu0 %1228 }
 0x6f5   : > { %v981_v47 = vrot.slane %v980_v45, 1  ;;  %v1230_v31 = vrot.slane %v1229_v29, 4 }
 0x6f7   : > { %v982_v1 = vadd.f32 %v981_v47, %v980_v45  ;;  %v1231_v33 = vadd.f32 %v1230_v31, %v1229_v29 }
 0x6f9   : > { %1841 = vpush %v982_v1  ;;  %v1232_v36 = vrot.slane %v1231_v33, 2 }
 0x6fa   : > { %1843 = vpush %v1111_v48 }
 0x6fb   : > { %v1233_v42 = vadd.f32 %v1232_v36, %v1231_v33 }
 0x6fd   : > { %v1234_v47 = vrot.slane %v1233_v42, 1 }
 0x6ff   : > { %v1235_v49 = vadd.f32 %v1234_v47, %v1233_v42 }
 0x72a   : > { %s2308_s27 = spop %1841 }
 0x72b   : > { %s1844_s28 = spop %1843  ;;  %v984_v60 = vstv %s2308_s27 }
 0x72c   : > { %v1113_v35 = vstv %s1844_s28  ;;  %v985_v20 = vmul.f32 %v984_v60, %v2124_v39 }
 0x72d   : > { %v1114_v63 = vmul.f32 %v1113_v35, %v2124_v39 }
 0x72f   : > { %v2312_v2 = vsub.f32 %v2258_v26, %v1114_v63  ;;  %v2315_v5 = vsub.f32 %v2260_v62, %v1114_v63  ;;  %v2318_v24 = vsub.f32 %v2264_v4, %v1114_v63  ;;  %v2321_v7 = vsub.f32 %v2266_v6, %v1114_v63 }
 0x730   : > { %v2004_v4 = vmov 10   ;;  %v2005_v6 = vmov 11  }
 0x731   : > { %v1119_v8 = vmul.f32 %v2312_v2, %v2312_v2  ;;  %v1120_v9 = vmul.f32 %v2315_v5, %v2315_v5  ;;  %v1121_v10 = vmul.f32 %v2318_v24, %v2318_v24  ;;  %v1122_v62 = vmul.f32 %v2321_v7, %v2321_v7  ;;  %1915 = vset.pattern.permute.xlu0 %v2005_v6 }
 0x733   : > { %v1123_v26 = vadd.f32 %v1120_v9, %v1119_v8 }
 0x735   : > { %v1124_v11 = vadd.f32 %v1123_v26, %v1121_v10 }
 0x737   : > { %v1125_v12 = vadd.f32 %v1124_v11, %v1122_v62 }
 0x739   : > { %1126 = vadd.xlane.f32.xlu2 %v1125_v12 }
 0x751   : > { %1300 = vperm.xlu2 %1908, %v2091_v0  }
 0x759   : > { %1910 = vset.pattern.permute.xlu2 %v2004_v4 }
 0x75a   : > { %1002 = vperm.xlu2 %1910, %v2091_v0  }
 0x762   : > { %1911 = vset.pattern.permute.xlu2 %v2006_v13 }
 0x763   : > { %1402 = vperm.xlu2 %1911, %v2091_v0  }
 0x76b   : > { %1406 = vperm.xlu2 %1911, %v2107_v3  }
 0x773   : > { %1912 = vset.pattern.permute.xlu2 %v2007_v57 }
 0x774   : > { %1414 = vperm.xlu2 %1912, %v2091_v0   ;;  %v986_v0 = vadd.f32 1e-05, %v985_v20  ;;  %v2373_v20 = vld [vmem:[%s2601_s10 + $0x8] sm:$0xff] }
 0x776   : > { %1938 = vrsqrt.f32 %v986_v0  ;;  %vm993_vm13 = vweird.f32 %v986_v0 }
 0x777   : > { %1940 = vrcp.f32 %v2010_v61 }
 0x77c   : > { %1914 = vset.pattern.permute.xlu2 %v2004_v4 }
 0x77d   : > { %1006 = vperm.xlu2 %1914, %v2107_v3  }
 0x785   : > { %1916 = vset.pattern.permute.xlu2 %v2005_v6 }
 0x786   : > { %1018 = vperm.xlu2 %1916, %v2107_v3   ;;  %v1939_v3 = vpop.eup %1938 }
 0x787   : > { %v988_v30 = vmul.f32 %v1939_v3, %v986_v0  ;;  %vm994_vm10 = vweird.f32 %v1939_v3  ;;  %v1941_v35 = vpop.eup %1940 }
 0x788   : > { %vm995_vm14 = vmor %vm993_vm13, %vm994_vm10  ;;  %v1239_v63 = vmul.f32 512.0, %v1941_v35  ;;  %vm1243_vm15 = vweird.f32 %v1941_v35 }
 0x789   : > { %v989_v32 = vmul.f32 %v1939_v3, %v988_v30 }
 0x78a   : > { %v1240_v8 = vsub.f32 1.0, %v1239_v63 }
 0x78b   : > { %v990_v34 = vmul.f32 0.5, %v989_v32 }
 0x78c   : > { %v1241_v9 = vmul.f32 %v1941_v35, %v1240_v8 }
 0x78d   : > { %v991_v41 = vsub.f32 1.5, %v990_v34 }
 0x78e   : > { %1917 = vset.pattern.permute.xlu2 %v2008_v14  ;;  %v1242_v10 = vadd.f32 %v1941_v35, %v1241_v9  ;;  %v1826_v9 = vld [vmem:[%s2600_s9] sm:$0xff] }
 0x78f   : > { %1153 = vperm.xlu2 %1917, %v2343_v59   ;;  %v992_v45 = vmul.f32 %v1939_v3, %v991_v41 }
 0x790   : > { %v1244_v26 = vsel %vm1243_vm15, %v1941_v35, %v1242_v10 }
 0x791   : > { %v2352_v51 = vsel %vm995_vm14, %v1939_v3, %v992_v45 }
 0x792   : > { %v997_v52 = vmul.f32 %v2352_v51, %v2282_v15  ;;  %v998_v55 = vmul.f32 %v2352_v51, %v2284_v18 }
 0x797   : > { %1919 = vset.pattern.permute.xlu2 %v2009_v50 }
 0x798   : > { %1165 = vperm.xlu2 %1919, %v2343_v59  }
 0x7ac   : > { %v1127_v37 = vpop.xlane.xlu2 %1126 }
 0x7ad   : > { %v1128_v38 = vrot.slane %v1127_v37, 4 }
 0x7af   : > { %v1129_v40 = vadd.f32 %v1128_v38, %v1127_v37 }
 0x7b1   : > { %v1130_v43 = vrot.slane %v1129_v40, 2 }
 0x7b3   : > { %v1131_v44 = vadd.f32 %v1130_v43, %v1129_v40  ;;  %v1279_v40 = vpop.permute.xlu0 %1278 }
 0x7b4   : > { %v2350_v46 = vpop.permute.xlu2 %1300 }
 0x7b5   : > { %v1132_v1 = vrot.slane %v1131_v44, 1 }
 0x7b7   : > { %v1133_v48 = vadd.f32 %v1132_v1, %v1131_v44 }
 0x7b9   : > { %1845 = vpush %v1133_v48 }
 0x7ba   : > { %1847 = vpush %v1235_v49 }
 0x7bc   : > { %v1003_v25 = vpop.permute.xlu2 %1002 }
 0x7bd   : > { %v2358_v56 = vmul.f32 %v1003_v25, %v997_v52  ;;  %v2360_v27 = vmul.f32 %v1003_v25, %v998_v55 }
 0x7ea   : > { %s2362_s30 = spop %1845 }
 0x7eb   : > { %s1848_s13 = spop %1847 }
 0x7ec   : > { %v1237_v15 = vstv %s1848_s13 }
 0x7ed   : > { %v1245_v62 = vmul.f32 %v1244_v26, %v1237_v15 }
 0x7ef   : > { %v1246_v18 = vsub.f32 %v2298_v53, %v1245_v62  ;;  %v1247_v11 = vsub.f32 %v2300_v54, %v1245_v62 }
 0x7f1   : > { %v1248_v12 = vmul.f32 %v1246_v18, %v1246_v18  ;;  %v1249_v4 = vmul.f32 %v1247_v11, %v1247_v11 }
 0x7f3   : > { %v1250_v6 = vsel %vm490_vm0, %v1248_v12, 0.0  ;;  %v1251_v13 = vsel %vm490_vm0, %v1249_v4, 0.0 }
 0x7f4   : > { %v1252_v60 = vadd.f32 %v1251_v13, %v1250_v6 }
 0x7f6   : > { %1253 = vadd.xlane.f32.xlu1 %v1252_v60 }
 0x80f   : > { %1284 = vperm.xlu1 %1907, %v2276_v58  }
 0x817   : > { %1909 = vset.pattern.permute.xlu1 %v2003_v28 }
 0x818   : > { %1304 = vperm.xlu1 %1909, %v2373_v20  }
 0x820   : > { %1913 = vset.pattern.permute.xlu1 %v2007_v57 }
 0x869   : > { %v1254_v53 = vpop.xlane.xlu1 %1253 }
 0x86a   : > { %v1255_v54 = vrot.slane %v1254_v53, 4 }
 0x86c   : > { %v1256_v0 = vadd.f32 %v1255_v54, %v1254_v53  ;;  %v2011_v54 = vmov 18  }
 0x86d   : > { %1921 = vset.pattern.permute.xlu2 %v2011_v54 }
 0x86e   : > { %v1257_v3 = vrot.slane %v1256_v0, 2  ;;  %1522 = vperm.xlu2 %1921, %v2343_v59  }
 0x870   : > { %v1258_v29 = vadd.f32 %v1257_v3, %v1256_v0  ;;  %v2012_v0 = vmov 19  }
 0x872   : > { %v1259_v30 = vrot.slane %v1258_v29, 1 }
 0x874   : > { %v1260_v31 = vadd.f32 %v1259_v30, %v1258_v29 }
 0x876   : > { %1849 = vpush %v1260_v31  ;;  %1923 = vset.pattern.permute.xlu2 %v2012_v0 }
 0x877   : > { %1534 = vperm.xlu2 %1923, %v2343_v59  }
 0x881   : > { %v1285_v44 = vpop.permute.xlu1 %1284 }
 0x8a7   : > { %s1850_s16 = spop %1849 }
 0x8a8   : > { %v1262_v58 = vstv %s1850_s16 }
 0x8a9   : > { %v1263_v28 = vmul.f32 %v1262_v58, %v1244_v26 }
 0x8ab   : > { %v1264_v32 = vadd.f32 1e-05, %v1263_v28 }
 0x8ad   : > { %1942 = vrsqrt.f32 %v1264_v32  ;;  %vm1271_vm1 = vweird.f32 %v1264_v32 }
 0x8b3   : > { %v1943_v33 = vpop.eup %1942 }
 0x8b4   : > { %v1266_v34 = vmul.f32 %v1943_v33, %v1264_v32  ;;  %vm1272_vm0 = vweird.f32 %v1943_v33 }
 0x8b5   : > { %vm1273_vm2 = vmor %vm1271_vm1, %vm1272_vm0 }
 0x8b6   : > { %v1267_v36 = vmul.f32 %v1943_v33, %v1266_v34 }
 0x8b8   : > { %v1268_v37 = vmul.f32 0.5, %v1267_v36 }
 0x8ba   : > { %v1269_v38 = vsub.f32 1.5, %v1268_v37 }
 0x8bc   : > { %v1270_v57 = vmul.f32 %v1943_v33, %v1269_v38 }
 0x8be   : > { %v1274_v41 = vsel %vm1273_vm2, %v1943_v33, %v1270_v57 }
 0x8bf   : > { %v1275_v42 = vmul.f32 %v1274_v41, %v1246_v18  ;;  %v1276_v43 = vmul.f32 %v1274_v41, %v1247_v11  ;;  %v1305_v18 = vpop.permute.xlu1 %1304 }
 0x8c1   : > { %v1281_v45 = vmul.f32 %v1279_v40, %v1275_v42  ;;  %v1282_v47 = vmul.f32 %v1279_v40, %v1276_v43 }
 0x8c3   : > { %v1287_v1 = vadd.f32 %v1285_v44, %v1281_v45  ;;  %v1288_v48 = vadd.f32 %v1285_v44, %v1282_v47  ;;  %v2014_v45 = vmov 21  }
 0x8c5   : > { %vm1289_vm3 = vcmp.ge.f32.partialorder %v1287_v1, 0.0  ;;  %vm1290_vm4 = vcmp.ge.f32.partialorder %v1288_v48, 0.0  ;;  %v1291_v49 = vmul.f32 0.01, %v1287_v1  ;;  %v1292_v52 = vmul.f32 0.01, %v1288_v48 }
 0x8c7   : > { %v1293_v55 = vsel %vm1289_vm3, %v1287_v1, %v1291_v49  ;;  %v1294_v25 = vsel %vm1290_vm4, %v1288_v48, %v1292_v52 }
 0x8c8   : > { %v1297_v61 = vpack.c.bf16 %v1293_v55, %v1293_v55  ;;  %v1298_v35 = vpack.c.bf16 %v1294_v25, %v1294_v25 }
 0x8ca   : > { %v1317_v63 = vsel %vm1064_vm11, %v1297_v61, 0  ;;  %v1320_v8 = vsel %vm1064_vm11, %v1298_v35, 0  ;;  %v1403_v61 = vpop.permute.xlu2 %1402 }
 0x8cb   : > { %1329 = vmatpush.bf16.msrb.mxu0 %v1317_v63  ;;  %1343 = vmatpush.bf16.msrb.mxu1 %v1320_v8  ;;  %v1135_v63 = vstv %s2362_s30 }
 0x8cc   : > { %v1136_v8 = vmul.f32 %v1135_v63, %v2124_v39 }
 0x8ce   : > { %1809 = vmatmul.msk.bf16.vlgmr.msrb.gmra.mxu0 %vm1312_vm5, %v1826_v9  ;;  %1810 = vmatmul.msk.bf16.vlgmr.msrb.gmra.mxu1 %vm1312_vm5, %v1826_v9  ;;  %v1137_v9 = vadd.f32 1e-05, %v1136_v8 }
 0x8d0   : > { %1944 = vrsqrt.f32 %v1137_v9  ;;  %vm1144_vm11 = vweird.f32 %v1137_v9 }
 0x8d2   : > { %v1407_v35 = vpop.permute.xlu2 %1406 }
 0x94b   : > { %v1331_v10 = vpop.f32.mrf.mxu0  ;;  %v1345_v26 = vpop.f32.mrf.mxu1 }
 0x94c   : > { %v1332_v15 = vadd.f32 %v1331_v10, %v2350_v46  ;;  %v1346_v62 = vadd.f32 %v1345_v26, %v2350_v46  ;;  %v2013_v46 = vmov 20   ;;  %v1415_v10 = vpop.permute.xlu2 %1414 }
 0x94d   : > { %1926 = vset.pattern.permute.xlu2 %v2013_v46 }
 0x94e   : > { %v1350_v4 = vadd.f32 %v1346_v62, %v1332_v15  ;;  %1554 = vperm.xlu2 %1926, %v2373_v20  }
 0x953   : > { %v1333_v11 = vpop.f32.mrf.mxu0  ;;  %v1347_v12 = vpop.f32.mrf.mxu1 }
 0x954   : > { %v1334_v6 = vadd.f32 %v1333_v11, %v1305_v18  ;;  %v1348_v13 = vadd.f32 %v1347_v12, %v1305_v18 }
 0x956   : > { %v1351_v60 = vadd.f32 %v1350_v4, %v1334_v6  ;;  %1928 = vset.pattern.permute.xlu2 %v2014_v45 }
 0x957   : > { %1570 = vperm.xlu2 %1928, %v2373_v20  }
 0x958   : > { %v1352_v53 = vadd.f32 %v1351_v60, %v1348_v13 }
 0x95a   : > { %1353 = vadd.xlane.f32.xlu1 %v1352_v53 }
 0x973   : > { %1418 = vperm.xlu1 %1913, %v2373_v20  }
 0x97b   : > { %1918 = vset.pattern.permute.xlu1 %v2008_v14 }
 0x97c   : > { %1157 = vperm.xlu1 %1918, %v2373_v20  }
 0x984   : > { %1920 = vset.pattern.permute.xlu1 %v2009_v50 }
 0x985   : > { %1169 = vperm.xlu1 %1920, %v2373_v20  }
 0x98d   : > { %1922 = vset.pattern.permute.xlu1 %v2011_v54 }
 0x98e   : > { %1526 = vperm.xlu1 %1922, %v2373_v20  }
 0x996   : > { %1925 = vset.pattern.permute.xlu1 %v2013_v46 }
 0x997   : > { %1550 = vperm.xlu1 %1925, %v2343_v59  }
 0x99f   : > { %1927 = vset.pattern.permute.xlu1 %v2014_v45 }
 0x9a0   : > { %1566 = vperm.xlu1 %1927, %v2343_v59  }
 0x9cd   : > { %v1354_v3 = vpop.xlane.xlu1 %1353 }
 0x9ce   : > { %v1355_v29 = vrot.slane %v1354_v3, 4 }
 0x9d0   : > { %v1356_v30 = vadd.f32 %v1355_v29, %v1354_v3 }
 0x9d2   : > { %v1357_v14 = vrot.slane %v1356_v30, 2 }
 0x9d4   : > { %v1358_v31 = vadd.f32 %v1357_v14, %v1356_v30 }
 0x9d6   : > { %v1359_v58 = vrot.slane %v1358_v31, 1 }
 0x9d8   : > { %v1360_v28 = vadd.f32 %v1359_v58, %v1358_v31 }
 0x9da   : > { %1851 = vpush %v1360_v28 }
 0x9e5   : > { %v1419_v46 = vpop.permute.xlu1 %1418 }
 0xa0b   : > { %s1852_s19 = spop %1851 }
 0xa0c   : > { %v1362_v32 = vstv %s1852_s19 }
 0xa0d   : > { %v1363_v50 = vmul.f32 %v1362_v32, %v2124_v39 }
 0xa0f   : > { %v1364_v33 = vsub.f32 %v1332_v15, %v1363_v50  ;;  %v1365_v34 = vsub.f32 %v1346_v62, %v1363_v50  ;;  %v1366_v36 = vsub.f32 %v1334_v6, %v1363_v50  ;;  %v1367_v37 = vsub.f32 %v1348_v13, %v1363_v50  ;;  %v1945_v15 = vpop.eup %1944  ;;  %v1007_v62 = vpop.permute.xlu2 %1006 }
 0xa10   : > { %v1139_v18 = vmul.f32 %v1945_v15, %v1137_v9  ;;  %vm1145_vm9 = vweird.f32 %v1945_v15 }
 0xa11   : > { %v1368_v38 = vmul.f32 %v1364_v33, %v1364_v33  ;;  %v1369_v57 = vmul.f32 %v1365_v34, %v1365_v34  ;;  %v1370_v40 = vmul.f32 %v1366_v36, %v1366_v36  ;;  %v1371_v42 = vmul.f32 %v1367_v37, %v1367_v37  ;;  %vm1146_vm12 = vmor %vm1144_vm11, %vm1145_vm9 }
 0xa12   : > { %v1140_v12 = vmul.f32 %v1945_v15, %v1139_v18 }
 0xa13   : > { %v1372_v41 = vadd.f32 %v1369_v57, %v1368_v38 }
 0xa14   : > { %v1141_v13 = vmul.f32 0.5, %v1140_v12 }
 0xa15   : > { %v1373_v43 = vadd.f32 %v1372_v41, %v1370_v40 }
 0xa17   : > { %v1374_v44 = vadd.f32 %v1373_v43, %v1371_v42  ;;  %v1019_v53 = vpop.permute.xlu2 %1018 }
 0xa19   : > { %1375 = vadd.xlane.f32.xlu0 %v1374_v44 }
 0xa1f   : > { %v1154_v57 = vpop.permute.xlu2 %1153 }
 0xa2d   : > { %1014 = vperm.xlu0 %1915, %v2343_v59  }
 0xa35   : > { %1924 = vset.pattern.permute.xlu0 %v2012_v0  ;;  %v1142_v0 = vsub.f32 1.5, %v1141_v13 }
 0xa36   : > { %1538 = vperm.xlu0 %1924, %v2373_v20  }
 0xa37   : > { %v1143_v58 = vmul.f32 %v1945_v15, %v1142_v0 }
 0xa39   : > { %v1147_v44 = vsel %vm1146_vm12, %v1945_v15, %v1143_v58 }
 0xa3a   : > { %v1149_v63 = vmul.f32 %v1147_v44, %v2315_v5  ;;  %v1151_v18 = vmul.f32 %v1147_v44, %v2321_v7 }
 0xa3e   : > { %1929 = vset.pattern.permute.xlu0 %v2014_v45 }
 0xa8c   : > { %v1376_v47 = vpop.xlane.xlu0 %1375 }
 0xa8d   : > { %v1377_v1 = vrot.slane %v1376_v47, 4 }
 0xa8f   : > { %v1378_v48 = vadd.f32 %v1377_v1, %v1376_v47 }
 0xa91   : > { %v1379_v49 = vrot.slane %v1378_v48, 2 }
 0xa93   : > { %v1380_v52 = vadd.f32 %v1379_v49, %v1378_v48 }
 0xa95   : > { %v1381_v55 = vrot.slane %v1380_v52, 1 }
 0xa97   : > { %v1382_v25 = vadd.f32 %v1381_v55, %v1380_v52  ;;  %v999_v52 = vmul.f32 %v2352_v51, %v2286_v19  ;;  %v1000_v55 = vmul.f32 %v2352_v51, %v2288_v21  ;;  %v1150_v19 = vmul.f32 %v1147_v44, %v2318_v24 }
 0xa99   : > { %1853 = vpush %v1382_v25 }
 0xaca   : > { %s1854_s20 = spop %1853 }
 0xacb   : > { %v1384_v59 = vstv %s1854_s20 }
 0xacc   : > { %v1385_v20 = vmul.f32 %v1384_v59, %v2124_v39  ;;  %v1161_v59 = vmul.f32 %v1154_v57, %v1149_v63 }
 0xace   : > { %v1386_v26 = vadd.f32 1e-05, %v1385_v20 }
 0xad0   : > { %1946 = vrsqrt.f32 %v1386_v26  ;;  %vm1393_vm7 = vweird.f32 %v1386_v26 }
 0xad6   : > { %v1947_v11 = vpop.eup %1946 }
 0xad7   : > { %v1388_v4 = vmul.f32 %v1947_v11, %v1386_v26  ;;  %vm1394_vm6 = vweird.f32 %v1947_v11 }
 0xad8   : > { %vm1395_vm8 = vmor %vm1393_vm7, %vm1394_vm6 }
 0xad9   : > { %v1389_v6 = vmul.f32 %v1947_v11, %v1388_v4  ;;  %v1015_v4 = vpop.permute.xlu0 %1014 }
 0xadb   : > { %v1390_v60 = vmul.f32 0.5, %v1389_v6 }
 0xadd   : > { %v1391_v54 = vsub.f32 1.5, %v1390_v60 }
 0xadf   : > { %v1392_v3 = vmul.f32 %v1947_v11, %v1391_v54 }
 0xae1   : > { %v1396_v39 = vsel %vm1395_vm8, %v1947_v11, %v1392_v3 }
 0xae2   : > { %v1397_v29 = vmul.f32 %v1396_v39, %v1364_v33  ;;  %v1398_v30 = vmul.f32 %v1396_v39, %v1365_v34  ;;  %v1399_v14 = vmul.f32 %v1396_v39, %v1366_v36  ;;  %v1400_v31 = vmul.f32 %v1396_v39, %v1367_v37  ;;  %v1158_v36 = vpop.permute.xlu1 %1157 }
 0xae3   : > { %v1148_v37 = vmul.f32 %v1147_v44, %v2312_v2  ;;  %v1162_v12 = vmul.f32 %v1158_v36, %v1150_v19  ;;  %v2429_v39 = vadd.f32 %v1015_v4, %v2358_v56 }
 0xae4   : > { %v1409_v28 = vmul.f32 %v1403_v61, %v1397_v29  ;;  %v1410_v32 = vmul.f32 %v1403_v61, %v1398_v30  ;;  %v1411_v50 = vmul.f32 %v1407_v35, %v1399_v14  ;;  %v1412_v38 = vmul.f32 %v1407_v35, %v1400_v31 }
 0xae5   : > { %v1011_v61 = vmul.f32 %v1007_v62, %v999_v52  ;;  %v1012_v35 = vmul.f32 %v1007_v62, %v1000_v55  ;;  %v1160_v8 = vmul.f32 %v1154_v57, %v1148_v37  ;;  %vm1025_vm4 = vcmp.ge.f32.partialorder %v2429_v39, 0.0 }
 0xae6   : > { %v1421_v40 = vadd.f32 %v1415_v10, %v1409_v28  ;;  %v1422_v41 = vadd.f32 %v1415_v10, %v1410_v32  ;;  %v1423_v42 = vadd.f32 %v1419_v46, %v1411_v50  ;;  %v1424_v43 = vadd.f32 %v1419_v46, %v1412_v38  ;;  %v1166_v10 = vpop.permute.xlu2 %1165 }
 0xae7   : > { %v1023_v9 = vadd.f32 %v1019_v53, %v1011_v61  ;;  %v1024_v2 = vadd.f32 %v1019_v53, %v1012_v35  ;;  %v1172_v26 = vadd.f32 %v1166_v10, %v1160_v8  ;;  %v2414_v60 = vadd.f32 %v1166_v10, %v1161_v59 }
 0xae8   : > { %v1425_v45 = vsub.f32 0.0, %v1421_v40  ;;  %v1426_v47 = vsub.f32 0.0, %v1422_v41  ;;  %v1427_v33 = vsub.f32 0.0, %v1423_v42  ;;  %v1428_v34 = vsub.f32 0.0, %v1424_v43 }
 0xae9   : > { %v1031_v21 = vmul.f32 0.01, %v1023_v9  ;;  %v1032_v51 = vmul.f32 0.01, %v1024_v2  ;;  %vm1027_vm10 = vcmp.ge.f32.partialorder %v1023_v9, 0.0  ;;  %vm1028_vm13 = vcmp.ge.f32.partialorder %v1024_v2, 0.0 }
 0xaea   : > { %v1429_v1 = vmul.f32 1.442695, %v1425_v45  ;;  %v1431_v48 = vmul.f32 1.442695, %v1426_v47  ;;  %v1433_v49 = vmul.f32 1.442695, %v1427_v33  ;;  %v1170_v62 = vpop.permute.xlu1 %1169  ;;  %v1163_v53 = vmul.f32 %v1158_v36, %v1151_v18 }
 0xaeb   : > { %v1435_v25 = vmul.f32 1.442695, %v1428_v34  ;;  %v1180_v54 = vmul.f32 0.01, %v1172_v26  ;;  %v2419_v7 = vadd.f32 %v1170_v62, %v1162_v12  ;;  %vm1176_vm14 = vcmp.ge.f32.partialorder %v1172_v26, 0.0 }
 0xaec   : > { %1948 = vpow2.f32 %v1429_v1  ;;  %v2426_v3 = vadd.f32 %v1170_v62, %v1163_v53  ;;  %v2434_v29 = vsel %vm1027_vm10, %v1023_v9, %v1031_v21  ;;  %v2437_v30 = vmul.f32 0.01, %v2414_v60 }
 0xaed   : > { %1950 = vpow2.f32 %v1431_v48  ;;  %v2440_v14 = vmul.f32 0.01, %v2419_v7  ;;  %v2442_v31 = vsel %vm1176_vm14, %v1172_v26, %v1180_v54  ;;  %v2445_v58 = vsel %vm1028_vm13, %v1024_v2, %v1032_v51 }
 0xaee   : > { %1952 = vpow2.f32 %v1433_v49  ;;  %v2424_v46 = vpop.permute.xlu2 %1522  ;;  %v2448_v28 = vmul.f32 0.01, %v2426_v3  ;;  %v2451_v32 = vadd.f32 %v1015_v4, %v2360_v27  ;;  %v2454_v50 = vmul.f32 0.01, %v2429_v39 }
 0xaef   : > { %1954 = vpow2.f32 %v1435_v25  ;;  %vm1177_vm7 = vcmp.ge.f32.partialorder %v2414_v60, 0.0 }
 0xaf2   : > { %v1949_v20 = vpop.eup %1948  ;;  %v2468_v36 = vpop.permute.xlu1 %1526 }
 0xaf3   : > { %v1951_v15 = vpop.eup %1950  ;;  %v2410_v11 = vadd.f32 1.0, %v1949_v20 }
 0xaf4   : > { %v1953_v5 = vpop.eup %1952  ;;  %v2412_v6 = vadd.f32 1.0, %v1951_v15 }
 0xaf5   : > { %v1955_v13 = vpop.eup %1954  ;;  %v2416_v24 = vadd.f32 1.0, %v1953_v5  ;;  %1956 = vrcp.f32 %v2410_v11  ;;  %vm1446_vm15 = vweird.f32 %v2410_v11  ;;  %v1450_v41 = vand.u32 2147483647, %v2410_v11 }
 0xaf6   : > { %v2421_v0 = vadd.f32 1.0, %v1955_v13  ;;  %1958 = vrcp.f32 %v2412_v6  ;;  %v1452_v42 = vand.u32 2147483648, %v2410_v11  ;;  %vm1461_vm1 = vweird.f32 %v2412_v6  ;;  %v2478_v61 = vpop.permute.xlu2 %1534 }
 0xaf7   : > { %1960 = vrcp.f32 %v2416_v24  ;;  %v1480_v38 = vand.u32 2147483647, %v2416_v24  ;;  %vm1476_vm0 = vweird.f32 %v2416_v24  ;;  %v1482_v27 = vand.u32 2147483648, %v2416_v24 }
 0xaf8   : > { %1962 = vrcp.f32 %v2421_v0  ;;  %vm1491_vm2 = vweird.f32 %v2421_v0  ;;  %v1495_v33 = vand.u32 2147483647, %v2421_v0  ;;  %v1497_v48 = vand.u32 2147483648, %v2421_v0 }
 0xaf9   : > { %vm2470_vm3 = vcmp.eq.f32.partialorder %v1480_v38, 8.507059e+37  ;;  %v1467_v25 = vand.u32 2147483648, %v2412_v6  ;;  %v1465_v8 = vand.u32 2147483647, %v2412_v6  ;;  %v1483_v2 = vor.u32 1.1754944e-38, %v1482_v27 }
 0xafa   : > { %v1453_v20 = vor.u32 1.1754944e-38, %v1452_v42  ;;  %vm1451_vm12 = vcmp.eq.f32.partialorder %v1450_v41, 8.507059e+37 }
 0xafb   : > { %v1957_v56 = vpop.eup %1956  ;;  %v1468_v21 = vor.u32 1.1754944e-38, %v1467_v25  ;;  %vm1466_vm14 = vcmp.eq.f32.partialorder %v1465_v8, 8.507059e+37 }
 0xafc   : > { %v1959_v57 = vpop.eup %1958  ;;  %v1442_v40 = vmul.f32 %v1957_v56, %v2410_v11  ;;  %vm1447_vm5 = vweird.f32 %v1957_v56  ;;  %v1498_v11 = vor.u32 1.1754944e-38, %v1497_v48  ;;  %v1185_v48 = vsel %vm1177_vm7, %v2414_v60, %v2437_v30 }
 0xafd   : > { %v1961_v43 = vpop.eup %1960  ;;  %v1457_v44 = vmul.f32 %v1959_v57, %v2412_v6  ;;  %vm1462_vm6 = vweird.f32 %v1959_v57  ;;  %vm1448_vm11 = vmor %vm1446_vm15, %vm1447_vm5  ;;  %vm1026_vm5 = vcmp.ge.f32.partialorder %v2451_v32, 0.0 }
 0xafe   : > { %v1963_v45 = vpop.eup %1962  ;;  %v1472_v47 = vmul.f32 %v1961_v43, %v2416_v24  ;;  %v1443_v34 = vsub.f32 1.0, %v1442_v40  ;;  %vm1477_vm8 = vweird.f32 %v1961_v43  ;;  %vm1463_vm10 = vmor %vm1461_vm1, %vm1462_vm6  ;;  %vm1496_vm1 = vcmp.eq.f32.partialorder %v1495_v33, 8.507059e+37  ;;  %v1555_v27 = vpop.permute.xlu2 %1554 }
 0xaff   : > { %v1487_v1 = vmul.f32 %v1963_v45, %v2421_v0  ;;  %v1458_v49 = vsub.f32 1.0, %v1457_v44  ;;  %vm1492_vm9 = vweird.f32 %v1963_v45  ;;  %vm1478_vm13 = vmor %vm1476_vm0, %vm1477_vm8  ;;  %v1030_v24 = vmul.f32 0.01, %v2451_v32 }
 0xb00   : > { %v1473_v52 = vsub.f32 1.0, %v1472_v47  ;;  %v1444_v55 = vmul.f32 %v1957_v56, %v1443_v34  ;;  %vm1493_vm15 = vmor %vm1491_vm2, %vm1492_vm9  ;;  %vm1178_vm0 = vcmp.ge.f32.partialorder %v2419_v7, 0.0  ;;  %vm1179_vm2 = vcmp.ge.f32.partialorder %v2426_v3, 0.0 }
 0xb01   : > { %v1488_v35 = vsub.f32 1.0, %v1487_v1  ;;  %v1459_v63 = vmul.f32 %v1959_v57, %v1458_v49  ;;  %v1033_v44 = vsel %vm1025_vm4, %v2429_v39, %v2454_v50  ;;  %v1034_v34 = vsel %vm1026_vm5, %v2451_v32, %v1030_v24  ;;  %v1539_v49 = vpop.permute.xlu0 %1538 }
 0xb02   : > { %v1474_v9 = vmul.f32 %v1961_v43, %v1473_v52  ;;  %v1445_v10 = vadd.f32 %v1957_v56, %v1444_v55 }
 0xb03   : > { %v1489_v59 = vmul.f32 %v1963_v45, %v1488_v35  ;;  %v1460_v26 = vadd.f32 %v1959_v57, %v1459_v63 }
 0xb04   : > { %v1475_v19 = vadd.f32 %v1961_v43, %v1474_v9  ;;  %v1449_v15 = vsel %vm1448_vm11, %v1957_v56, %v1445_v10 }
 0xb05   : > { %v1490_v51 = vadd.f32 %v1963_v45, %v1489_v59  ;;  %v1454_v18 = vsel %vm1451_vm12, %v1453_v20, %v1449_v15  ;;  %v1464_v62 = vsel %vm1463_vm10, %v1959_v57, %v1460_v26  ;;  %v1551_v57 = vpop.permute.xlu1 %1550 }
 0xb06   : > { %v1479_v5 = vsel %vm1478_vm13, %v1961_v43, %v1475_v19  ;;  %v1469_v12 = vsel %vm1466_vm14, %v1468_v21, %v1464_v62  ;;  %v1501_v4 = vmax.f32 %v1454_v18, 1e-06  ;;  %v1558_v63 = vmul.f32 %v1551_v57, %v1185_v48  ;;  %v1571_v59 = vpop.permute.xlu2 %1570 }
 0xb07   : > { %v1484_v6 = vsel %vm2470_vm3, %v1483_v2, %v1479_v5  ;;  %v1494_v13 = vsel %vm1493_vm15, %v1963_v45, %v1490_v51  ;;  %v1502_v53 = vmax.f32 %v1469_v12, 1e-06 }
 0xb08   : > { %v1499_v54 = vsel %vm1496_vm1, %v1498_v11, %v1494_v13  ;;  %v1503_v56 = vmax.f32 %v1484_v6, 1e-06  ;;  %v1505_v38 = vmin.f32 %v1501_v4, 0.999999 }
 0xb09   : > { %v1504_v0 = vmax.f32 %v1499_v54, 1e-06  ;;  %v1506_v40 = vmin.f32 %v1502_v53, 0.999999 }
 0xb0a   : > { %v1507_v41 = vmin.f32 %v1503_v56, 0.999999  ;;  %v2499_v42 = vmul.f32 %v1505_v38, %v2234_v22  ;;  %v1513_v43 = vsub.f32 1.0, %v1505_v38 }
 0xb0b   : > { %v1508_v45 = vmin.f32 %v1504_v0, 0.999999  ;;  %v2506_v47 = vmul.f32 %v1506_v40, %v2237_v23  ;;  %v1514_v33 = vsub.f32 1.0, %v1506_v40 }
 0xb0c   : > { %v2510_v37 = vmul.f32 %v1507_v41, %v2229_v16  ;;  %v1515_v1 = vsub.f32 1.0, %v1507_v41  ;;  %v2512_v22 = vmul.f32 %v1513_v43, %v1033_v44  ;;  %v1186_v16 = vsel %vm1178_vm0, %v2419_v7, %v2440_v14 }
 0xb0d   : > { %v2519_v39 = vmul.f32 %v1508_v45, %v2231_v17  ;;  %v1516_v23 = vsub.f32 1.0, %v1508_v45  ;;  %v2521_v50 = vmul.f32 %v1514_v33, %v1034_v34  ;;  %v1529_v52 = vmul.f32 %v2424_v46, %v2499_v42 }
 0xb0e   : > { %v2528_v32 = vmul.f32 %v1515_v1, %v2434_v29  ;;  %v1541_v60 = vmul.f32 %v2478_v61, %v2512_v22  ;;  %v1187_v17 = vsel %vm1179_vm2, %v2426_v3, %v2448_v28  ;;  %v1530_v7 = vmul.f32 %v2424_v46, %v2506_v47  ;;  %v1567_v28 = vpop.permute.xlu1 %1566 }
 0xb0f   : > { %v2539_v30 = vmul.f32 %v1516_v23, %v2445_v58  ;;  %v1542_v29 = vmul.f32 %v2478_v61, %v2521_v50  ;;  %v1557_v14 = vmul.f32 %v1551_v57, %v2442_v31  ;;  %v1531_v55 = vmul.f32 %v2468_v36, %v2510_v37 }
 0xb10   : > { %v1543_v25 = vmul.f32 %v1539_v49, %v2528_v32  ;;  %v1545_v35 = vadd.f32 %v1541_v60, %v1529_v52  ;;  %v1532_v3 = vmul.f32 %v2468_v36, %v2519_v39  ;;  %v1559_v46 = vmul.f32 %v1555_v27, %v1186_v16 }
 0xb11   : > { %v1544_v58 = vmul.f32 %v1539_v49, %v2539_v30  ;;  %v1546_v8 = vadd.f32 %v1542_v29, %v1530_v7  ;;  %v1560_v61 = vmul.f32 %v1555_v27, %v1187_v17 }
 0xb12   : > { %v1547_v9 = vadd.f32 %v1543_v25, %v1531_v55  ;;  %v1561_v2 = vadd.f32 %v1557_v14, %v1545_v35 }
 0xb13   : > { %v1548_v10 = vadd.f32 %v1544_v58, %v1532_v3  ;;  %v1562_v31 = vadd.f32 %v1558_v63, %v1546_v8 }
 0xb14   : > { %v1573_v20 = vadd.f32 %v1567_v28, %v1561_v2  ;;  %v1563_v26 = vadd.f32 %v1559_v46, %v1547_v9 }
 0xb15   : > { %v1574_v19 = vadd.f32 %v1567_v28, %v1562_v31  ;;  %v1564_v15 = vadd.f32 %v1560_v61, %v1548_v10 }
 0xb16   : > { %v1811_v21 = vclamps-f32 %v1573_v20, 10.0  ;;  %v1575_v51 = vadd.f32 %v1571_v59, %v1563_v26 }
 0xb17   : > { %v1812_v18 = vclamps-f32 %v1574_v19, 10.0  ;;  %v1576_v62 = vadd.f32 %v1571_v59, %v1564_v15 }
 0xb18   : > { %v1585_v36 = vsub.f32 0.0, %v1811_v21  ;;  %v1813_v5 = vclamps-f32 %v1575_v51, 10.0 }
 0xb19   : > { %v1586_v11 = vsub.f32 0.0, %v1812_v18  ;;  %v1814_v12 = vclamps-f32 %v1576_v62, 10.0 }
 0xb1a   : > { %v1589_v4 = vmul.f32 1.442695, %v1585_v36  ;;  %v1587_v6 = vsub.f32 0.0, %v1813_v5 }
 0xb1b   : > { %v1591_v13 = vmul.f32 1.442695, %v1586_v11  ;;  %v1588_v53 = vsub.f32 0.0, %v1814_v12 }
 0xb1c   : > { %1964 = vpow2.f32 %v1589_v4  ;;  %v1593_v24 = vmul.f32 1.442695, %v1587_v6 }
 0xb1d   : > { %1966 = vpow2.f32 %v1591_v13  ;;  %v1595_v54 = vmul.f32 1.442695, %v1588_v53 }
 0xb1e   : > { %1968 = vpow2.f32 %v1593_v24 }
 0xb1f   : > { %1970 = vpow2.f32 %v1595_v54 }
 0xb22   : > { %v1965_v56 = vpop.eup %1964 }
 0xb23   : > { %v1967_v38 = vpop.eup %1966  ;;  %v1597_v57 = vadd.f32 1.0, %v1965_v56 }
 0xb24   : > { %v1969_v0 = vpop.eup %1968  ;;  %v1598_v40 = vadd.f32 1.0, %v1967_v38 }
 0xb25   : > { %v1971_v41 = vpop.eup %1970  ;;  %1972 = vrcp.f32 %v1597_v57  ;;  %v1599_v43 = vadd.f32 1.0, %v1969_v0  ;;  %v1610_v45 = vand.u32 2147483647, %v1597_v57  ;;  %v1612_v33 = vand.u32 2147483648, %v1597_v57 }
 0xb26   : > { %1974 = vrcp.f32 %v1598_v40  ;;  %v2552_v27 = vadd.f32 1.0, %v1971_v41  ;;  %v1625_v34 = vand.u32 2147483647, %v1598_v40  ;;  %v1627_v49 = vand.u32 2147483648, %v1598_v40 }
 0xb27   : > { %1976 = vrcp.f32 %v1599_v43  ;;  %vm1606_vm3 = vweird.f32 %v1597_v57  ;;  %vm1621_vm4 = vweird.f32 %v1598_v40  ;;  %vm2555_vm6 = vcmp.eq.f32.partialorder %v1610_v45, 8.507059e+37 }
 0xb28   : > { %1978 = vrcp.f32 %v2552_v27  ;;  %v1613_v17 = vor.u32 1.1754944e-38, %v1612_v33  ;;  %vm2559_vm7 = vcmp.eq.f32.partialorder %v1625_v34, 8.507059e+37  ;;  %v1628_v25 = vor.u32 1.1754944e-38, %v1627_v49 }
 0xb29   : > { %vm1636_vm11 = vweird.f32 %v1599_v43  ;;  %v1640_v8 = vand.u32 2147483647, %v1599_v43  ;;  %v1642_v46 = vand.u32 2147483648, %v1599_v43  ;;  %vm1651_vm10 = vweird.f32 %v2552_v27 }
 0xb2a   : > { %v1655_v61 = vand.u32 2147483647, %v2552_v27  ;;  %v1657_v59 = vand.u32 2147483648, %v2552_v27 }
 0xb2b   : > { %v1973_v44 = vpop.eup %1972  ;;  %v1643_v5 = vor.u32 1.1754944e-38, %v1642_v46  ;;  %vm1641_vm0 = vcmp.eq.f32.partialorder %v1640_v8, 8.507059e+37 }
 0xb2c   : > { %v1975_v1 = vpop.eup %1974  ;;  %v1602_v48 = vmul.f32 %v1973_v44, %v1597_v57  ;;  %vm1607_vm8 = vweird.f32 %v1973_v44  ;;  %v1658_v6 = vor.u32 1.1754944e-38, %v1657_v59  ;;  %vm1656_vm2 = vcmp.eq.f32.partialorder %v1655_v61, 8.507059e+37 }
 0xb2d   : > { %v1617_v23 = vmul.f32 %v1975_v1, %v1598_v40  ;;  %v1977_v52 = vpop.eup %1976  ;;  %vm1622_vm9 = vweird.f32 %v1975_v1  ;;  %vm1608_vm12 = vmor %vm1606_vm3, %vm1607_vm8 }
 0xb2e   : > { %v1603_v16 = vsub.f32 1.0, %v1602_v48  ;;  %v1979_v14 = vpop.eup %1978  ;;  %v1632_v35 = vmul.f32 %v1977_v52, %v1599_v43  ;;  %vm1623_vm13 = vmor %vm1621_vm4, %vm1622_vm9  ;;  %vm1637_vm14 = vweird.f32 %v1977_v52 }
 0xb2f   : > { %v1618_v7 = vsub.f32 1.0, %v1617_v23  ;;  %v1647_v3 = vmul.f32 %v1979_v14, %v2552_v27  ;;  %vm1652_vm15 = vweird.f32 %v1979_v14  ;;  %vm1638_vm1 = vmor %vm1636_vm11, %vm1637_vm14 }
 0xb30   : > { %v1604_v55 = vmul.f32 %v1973_v44, %v1603_v16  ;;  %v1633_v28 = vsub.f32 1.0, %v1632_v35  ;;  %vm1653_vm5 = vmor %vm1651_vm10, %vm1652_vm15 }
 0xb31   : > { %v1619_v63 = vmul.f32 %v1975_v1, %v1618_v7  ;;  %v1648_v2 = vsub.f32 1.0, %v1647_v3 }
 0xb32   : > { %v1605_v58 = vadd.f32 %v1973_v44, %v1604_v55  ;;  %v1634_v31 = vmul.f32 %v1977_v52, %v1633_v28 }
 0xb33   : > { %v1620_v9 = vadd.f32 %v1975_v1, %v1619_v63  ;;  %v1649_v19 = vmul.f32 %v1979_v14, %v1648_v2 }
 0xb34   : > { %v1609_v10 = vsel %vm1608_vm12, %v1973_v44, %v1605_v58  ;;  %v1635_v18 = vadd.f32 %v1977_v52, %v1634_v31 }
 0xb35   : > { %v1614_v20 = vsel %vm2555_vm6, %v1613_v17, %v1609_v10  ;;  %v1624_v26 = vsel %vm1623_vm13, %v1975_v1, %v1620_v9  ;;  %v1650_v11 = vadd.f32 %v1979_v14, %v1649_v19 }
 0xb36   : > { %v1629_v15 = vsel %vm2559_vm7, %v1628_v25, %v1624_v26  ;;  %v1661_v21 = vmul.f32 %v1614_v20, %v2512_v22  ;;  %v1665_v51 = vsub.f32 1.0, %v1614_v20  ;;  %v1639_v4 = vsel %vm1638_vm1, %v1977_v52, %v1635_v18 }
 0xb37   : > { %v1662_v62 = vmul.f32 %v1629_v15, %v2521_v50  ;;  %v1666_v36 = vsub.f32 1.0, %v1629_v15  ;;  %v1644_v50 = vsel %vm1641_vm0, %v1643_v5, %v1639_v4  ;;  %v1654_v13 = vsel %vm1653_vm5, %v1979_v14, %v1650_v11 }
 0xb38   : > { %v1669_v12 = vmul.f32 %v1665_v51, %v2499_v42  ;;  %v1659_v24 = vsel %vm1656_vm2, %v1658_v6, %v1654_v13  ;;  %v1663_v54 = vmul.f32 %v1644_v50, %v2528_v32  ;;  %v1667_v42 = vsub.f32 1.0, %v1644_v50 }
 0xb39   : > { %v1670_v22 = vmul.f32 %v1666_v36, %v2506_v47  ;;  %v1664_v38 = vmul.f32 %v1659_v24, %v2539_v30  ;;  %v1668_v57 = vsub.f32 1.0, %v1659_v24 }
 0xb3a   : > { %v1673_v53 = vadd.f32 %v1669_v12, %v1661_v21  ;;  %v1671_v0 = vmul.f32 %v1667_v42, %v2510_v37 }
 0xb3b   : > { %v1674_v56 = vadd.f32 %v1670_v22, %v1662_v62  ;;  %v1672_v40 = vmul.f32 %v1668_v57, %v2519_v39 }
 0xb3c   : > { %1677 = vst [vmem:[%s453_s26] sm:$0xff] %v1673_v53  ;;  %v1675_v41 = vadd.f32 %v1671_v0, %v1663_v54 }
 0xb3d   : > { %1678 = vst [vmem:[%s453_s26 + $0x8] sm:$0xff] %v1674_v56  ;;  %v1676_v47 = vadd.f32 %v1672_v40, %v1664_v38 }
 0xb3e   : > { %1679 = vst [vmem:[%s453_s26 + $0x10] sm:$0xff] %v1675_v41 }
 0xb3f   : > { %1680 = vst [vmem:[%s453_s26 + $0x18] sm:$0xff] %v1676_v47 }
 0xb40 PF: > { %s22_s21 = sadd.s32 1, %s1988_s21  }
 0xb41   : > { %p19_p4 = scmp.ge.s32.totalorder %s22_s21, 4  }
 0xb43   :  { %21 = sbr.rel (!%p19_p4) target bundleno = 1 (0x1), region = 104 }

</bundles_post_ra>
